<compile_context>
chip_gen: v7x
topology: tpu7x:2x2x1
jax: 0.10.0
libtpu: 0.0.40
codegen_flags: <defaults>
</compile_context>

<pallas_src>
import jax
import jax.numpy as jnp
from jax.experimental import pallas as pl
from jax.experimental.pallas import tpu as pltpu

TEXT_DIM = 300
TEXT_PAD = 304            # sublane-aligned K for the text weight (mult of 16)
IMAGE_DIM = 2048
SOUND_DIM = 1024
HIDDEN = 128
SHARED_DIM = 32
OUT_PAD = 128             # lane-dense output slab (3*SHARED_DIM=96 -> 128)
BATCH = 4

K_STEPS = 2               # pipelined reduction steps over the large K dims
IMG_TK = IMAGE_DIM // K_STEPS   # 1024
SND_TK = SOUND_DIM // K_STEPS   # 512


def fusion_kernel(text_ref, image_ref, sound_ref,
                  tw1_ref, tb1_ref, tw2_ref, tb2_ref,
                  iw1_ref, ib1_ref, iw2_ref, ib2_ref,
                  sw1_ref, sb1_ref, sw2_ref, sb2_ref,
                  o_ref, h_acc):
    """relu(x@W1+b1)@W2+b2 per modality; image/sound first layers are
    K-pipelined over the grid with an f32 accumulator; output written once,
    lane-dense, at the final step."""
    k = pl.program_id(0)

    @pl.when(k == 0)
    def _():
        h_acc[...] = jnp.zeros_like(h_acc)

    # Accumulate first-layer partial products for the two large modalities.
    h_acc[0] += jnp.dot(
        image_ref[...].astype(jnp.bfloat16), iw1_ref[...],
        preferred_element_type=jnp.float32)
    h_acc[1] += jnp.dot(
        sound_ref[...].astype(jnp.bfloat16), sw1_ref[...],
        preferred_element_type=jnp.float32)

    @pl.when(k == pl.num_programs(0) - 1)
    def _():
        # Text encoder: small K (304), weights resident -> single shot.
        ht = jnp.dot(text_ref[...].astype(jnp.bfloat16), tw1_ref[...],
                     preferred_element_type=jnp.float32) + tb1_ref[...]
        hi = h_acc[0] + ib1_ref[...]
        hs = h_acc[1] + sb1_ref[...]
        ht = jnp.maximum(ht, 0.0).astype(jnp.bfloat16)
        hi = jnp.maximum(hi, 0.0).astype(jnp.bfloat16)
        hs = jnp.maximum(hs, 0.0).astype(jnp.bfloat16)
        t = jnp.dot(ht, tw2_ref[...],
                    preferred_element_type=jnp.float32) + tb2_ref[...]
        i = jnp.dot(hi, iw2_ref[...],
                    preferred_element_type=jnp.float32) + ib2_ref[...]
        s = jnp.dot(hs, sw2_ref[...],
                    preferred_element_type=jnp.float32) + sb2_ref[...]
        pad = jnp.zeros((o_ref.shape[0], o_ref.shape[1] - 3 * SHARED_DIM),
                        jnp.float32)
        # Single unmasked 128-lane store.
        o_ref[...] = jnp.concatenate([t, i, s, pad], axis=-1)


def _resident(shape):
    # Whole array as one block with a constant index_map: DMA'd once, stays
    # resident in VMEM across the reduction grid.
    return pl.BlockSpec(shape, lambda k: (0,) * len(shape))


def fusion_forward(text, image, sound, params):
    B = text.shape[0]
    Bp = ((B + 7) // 8) * 8   # sublane-aligned batch

    text_p = jnp.pad(text, ((0, Bp - B), (0, TEXT_PAD - text.shape[1])))
    image_p = jnp.pad(image, ((0, Bp - B), (0, 0)))
    sound_p = jnp.pad(sound, ((0, Bp - B), (0, 0)))

    p = params
    args = [text_p, image_p, sound_p,
            p["tw1"], p["tb1"], p["tw2"], p["tb2"],
            p["iw1"], p["ib1"], p["iw2"], p["ib2"],
            p["sw1"], p["sb1"], p["sw2"], p["sb2"]]

    in_specs = [
        _resident((Bp, TEXT_PAD)),                          # text (resident)
        pl.BlockSpec((Bp, IMG_TK), lambda k: (0, k)),       # image, K-tiled
        pl.BlockSpec((Bp, SND_TK), lambda k: (0, k)),       # sound, K-tiled
        _resident((TEXT_PAD, HIDDEN)),                      # tw1
        _resident((1, HIDDEN)),                             # tb1
        _resident((HIDDEN, SHARED_DIM)),                    # tw2
        _resident((1, SHARED_DIM)),                         # tb2
        pl.BlockSpec((IMG_TK, HIDDEN), lambda k: (k, 0)),   # iw1, K-tiled
        _resident((1, HIDDEN)),                             # ib1
        _resident((HIDDEN, SHARED_DIM)),                    # iw2
        _resident((1, SHARED_DIM)),                         # ib2
        pl.BlockSpec((SND_TK, HIDDEN), lambda k: (k, 0)),   # sw1, K-tiled
        _resident((1, HIDDEN)),                             # sb1
        _resident((HIDDEN, SHARED_DIM)),                    # sw2
        _resident((1, SHARED_DIM)),                         # sb2
    ]

    flops = 2 * Bp * ((TEXT_PAD + IMAGE_DIM + SOUND_DIM) * HIDDEN
                      + 3 * HIDDEN * SHARED_DIM)
    bytes_accessed = (
        (TEXT_PAD + IMAGE_DIM + SOUND_DIM) * HIDDEN * 2      # bf16 W1s
        + 3 * HIDDEN * SHARED_DIM * 2                        # bf16 W2s
        + 3 * (HIDDEN + SHARED_DIM) * 4                      # f32 biases
        + Bp * (TEXT_PAD + IMAGE_DIM + SOUND_DIM) * 4        # f32 inputs
        + Bp * OUT_PAD * 4)                                  # f32 output

    out = pl.pallas_call(
        fusion_kernel,
        out_shape=jax.ShapeDtypeStruct((Bp, OUT_PAD), jnp.float32),
        grid=(K_STEPS,),
        in_specs=in_specs,
        out_specs=pl.BlockSpec((Bp, OUT_PAD), lambda k: (0, 0)),
        scratch_shapes=[pltpu.VMEM((2, Bp, HIDDEN), jnp.float32)],
        compiler_params=pltpu.CompilerParams(
            dimension_semantics=("arbitrary",)),
        cost_estimate=pl.CostEstimate(flops=flops, transcendentals=0,
                                      bytes_accessed=bytes_accessed),
    )(*args)
    return out[:B, :3 * SHARED_DIM]


def init_params(key):
    """nn.Linear-style init; weights stored transposed (in, out) in bf16,
    biases f32. tw1 rows zero-padded 300 -> 304 (exact)."""
    ks = jax.random.split(key, 12)

    def linear(kw, kb, fan_in, fan_out, pad_in=None):
        bound = 1.0 / (fan_in ** 0.5)
        w = jax.random.uniform(kw, (fan_in, fan_out), jnp.float32, -bound, bound)
        b = jax.random.uniform(kb, (1, fan_out), jnp.float32, -bound, bound)
        if pad_in is not None and pad_in > fan_in:
            w = jnp.pad(w, ((0, pad_in - fan_in), (0, 0)))
        return w.astype(jnp.bfloat16), b

    tw1, tb1 = linear(ks[0], ks[1], TEXT_DIM, HIDDEN, pad_in=TEXT_PAD)
    tw2, tb2 = linear(ks[2], ks[3], HIDDEN, SHARED_DIM)
    iw1, ib1 = linear(ks[4], ks[5], IMAGE_DIM, HIDDEN)
    iw2, ib2 = linear(ks[6], ks[7], HIDDEN, SHARED_DIM)
    sw1, sb1 = linear(ks[8], ks[9], SOUND_DIM, HIDDEN)
    sw2, sb2 = linear(ks[10], ks[11], HIDDEN, SHARED_DIM)
    return dict(tw1=tw1, tb1=tb1, tw2=tw2, tb2=tb2,
                iw1=iw1, ib1=ib1, iw2=iw2, ib2=ib2,
                sw1=sw1, sb1=sb1, sw2=sw2, sb2=sb2)


def reference_forward(text, image, sound, p):
    """Pure-JAX reference using the same bf16 weights / cast discipline."""
    def enc(x, w1, b1, w2, b2):
        h = jnp.dot(x.astype(jnp.bfloat16), w1,
                    preferred_element_type=jnp.float32) + b1
        h = jnp.maximum(h, 0.0).astype(jnp.bfloat16)
        return jnp.dot(h, w2, preferred_element_type=jnp.float32) + b2

    text_p = jnp.pad(text, ((0, 0), (0, TEXT_PAD - text.shape[1])))
    t = enc(text_p, p["tw1"], p["tb1"], p["tw2"], p["tb2"])
    i = enc(image, p["iw1"], p["ib1"], p["iw2"], p["ib2"])
    s = enc(sound, p["sw1"], p["sb1"], p["sw2"], p["sb2"])
    return jnp.concatenate([t, i, s], axis=1)


if __name__ == "__main__":
    key = jax.random.PRNGKey(0)
    k_text, k_image, k_sound, k_params = jax.random.split(key, 4)
    text = jax.random.normal(k_text, (BATCH, TEXT_DIM), jnp.float32)
    image = jax.random.normal(k_image, (BATCH, IMAGE_DIM), jnp.float32)
    sound = jax.random.normal(k_sound, (BATCH, SOUND_DIM), jnp.float32)
    params = init_params(k_params)

    out = jax.block_until_ready(fusion_forward(text, image, sound, params))
    ref = reference_forward(text, image, sound, params)

    assert out.shape == (BATCH, 3 * SHARED_DIM), out.shape
    assert jnp.allclose(out, ref, atol=2e-2, rtol=2e-2), "mismatch vs reference"
    print("KERNEL_OK")
</pallas_src>

<mosaic_0001>
module attributes {stable_mosaic.version = 11 : i64} {
  func.func @fusion_kernel(%arg0: i32, %arg1: memref<8x304xf32, #tpu.memory_space<vmem>>, %arg2: memref<8x1024xf32, #tpu.memory_space<vmem>>, %arg3: memref<8x512xf32, #tpu.memory_space<vmem>>, %arg4: memref<304x128xbf16, #tpu.memory_space<vmem>>, %arg5: memref<1x128xf32, #tpu.memory_space<vmem>>, %arg6: memref<128x32xbf16, #tpu.memory_space<vmem>>, %arg7: memref<1x32xf32, #tpu.memory_space<vmem>>, %arg8: memref<1024x128xbf16, #tpu.memory_space<vmem>>, %arg9: memref<1x128xf32, #tpu.memory_space<vmem>>, %arg10: memref<128x32xbf16, #tpu.memory_space<vmem>>, %arg11: memref<1x32xf32, #tpu.memory_space<vmem>>, %arg12: memref<512x128xbf16, #tpu.memory_space<vmem>>, %arg13: memref<1x128xf32, #tpu.memory_space<vmem>>, %arg14: memref<128x32xbf16, #tpu.memory_space<vmem>>, %arg15: memref<1x32xf32, #tpu.memory_space<vmem>>, %arg16: memref<8x128xf32, #tpu.memory_space<vmem>>, %arg17: memref<2x8x128xf32, #tpu.memory_space<vmem>>) attributes {dimension_semantics = [#tpu.dimension_semantics<arbitrary>], iteration_bounds = array<i64: 2>, scalar_prefetch = 0 : i64, scratch_operands = 1 : i64, tpu.core_type = #tpu.core_type<tc>, window_params = [{pipeline_mode = #tpu.pipeline_mode<synchronous>, transform_indices = @transform_0, window_bounds = array<i64: 8, 304>}, {transform_indices = @transform_1, window_bounds = array<i64: 8, 1024>}, {transform_indices = @transform_2, window_bounds = array<i64: 8, 512>}, {pipeline_mode = #tpu.pipeline_mode<synchronous>, transform_indices = @transform_3, window_bounds = array<i64: 304, 128>}, {pipeline_mode = #tpu.pipeline_mode<synchronous>, transform_indices = @transform_4, window_bounds = array<i64: 1, 128>}, {pipeline_mode = #tpu.pipeline_mode<synchronous>, transform_indices = @transform_5, window_bounds = array<i64: 128, 32>}, {pipeline_mode = #tpu.pipeline_mode<synchronous>, transform_indices = @transform_6, window_bounds = array<i64: 1, 32>}, {transform_indices = @transform_7, window_bounds = array<i64: 1024, 128>}, {pipeline_mode = #tpu.pipeline_mode<synchronous>, transform_indices = @transform_8, window_bounds = array<i64: 1, 128>}, {pipeline_mode = #tpu.pipeline_mode<synchronous>, transform_indices = @transform_9, window_bounds = array<i64: 128, 32>}, {pipeline_mode = #tpu.pipeline_mode<synchronous>, transform_indices = @transform_10, window_bounds = array<i64: 1, 32>}, {transform_indices = @transform_11, window_bounds = array<i64: 512, 128>}, {pipeline_mode = #tpu.pipeline_mode<synchronous>, transform_indices = @transform_12, window_bounds = array<i64: 1, 128>}, {pipeline_mode = #tpu.pipeline_mode<synchronous>, transform_indices = @transform_13, window_bounds = array<i64: 128, 32>}, {pipeline_mode = #tpu.pipeline_mode<synchronous>, transform_indices = @transform_14, window_bounds = array<i64: 1, 32>}, {pipeline_mode = #tpu.pipeline_mode<synchronous>, transform_indices = @transform_15, window_bounds = array<i64: 8, 128>}]} {
    %c0_i32 = arith.constant 0 : i32
    %0 = arith.cmpi eq, %arg0, %c0_i32 : i32
    %1 = arith.extui %0 : i1 to i32
    %c0_i32_0 = arith.constant 0 : i32
    %2 = arith.cmpi ne, %1, %c0_i32_0 : i32
    scf.if %2 {
      %cst_21 = arith.constant 0.000000e+00 : f32
      %26 = vector.broadcast %cst_21 : f32 to vector<2x8x128xf32>
      %c0_22 = arith.constant 0 : index
      %c0_23 = arith.constant 0 : index
      %c0_24 = arith.constant 0 : index
      %27 = vector.load %arg17[%c0_22, %c0_23, %c0_24] : memref<2x8x128xf32, #tpu.memory_space<vmem>>, vector<2x8x128xf32>
      tpu.vector_store %arg17[%c0_22, %c0_23, %c0_24], %26 {strides = array<i32>} : memref<2x8x128xf32, #tpu.memory_space<vmem>>, vector<2x8x128xf32>,
    } else {
    }
    %c0 = arith.constant 0 : index
    %c0_1 = arith.constant 0 : index
    %c0_2 = arith.constant 0 : index
    %3 = vector.load %arg17[%c0, %c0_1, %c0_2] : memref<2x8x128xf32, #tpu.memory_space<vmem>>, vector<1x8x128xf32>
    %4 = vector.shape_cast %3 : vector<1x8x128xf32> to vector<8x128xf32>
    %c0_3 = arith.constant 0 : index
    %c0_4 = arith.constant 0 : index
    %5 = vector.load %arg2[%c0_3, %c0_4] : memref<8x1024xf32, #tpu.memory_space<vmem>>, vector<8x1024xf32>
    %6 = arith.truncf %5 : vector<8x1024xf32> to vector<8x1024xbf16>
    %c0_5 = arith.constant 0 : index
    %c0_6 = arith.constant 0 : index
    %7 = vector.load %arg8[%c0_5, %c0_6] : memref<1024x128xbf16, #tpu.memory_space<vmem>>, vector<1024x128xbf16>
    %cst = arith.constant dense<0.000000e+00> : vector<8x128xf32>
    %8 = tpu.matmul %6, %7, %cst {dimension_numbers = #tpu.dot_dimension_numbers<[1], [0], [0], [1], [0, 0, 1, 1], [], []>} : vector<8x1024xbf16>, vector<1024x128xbf16>, vector<8x128xf32> -> vector<8x128xf32>
    %9 = arith.addf %4, %8 : vector<8x128xf32>
    %c0_7 = arith.constant 0 : index
    %c0_8 = arith.constant 0 : index
    %c0_9 = arith.constant 0 : index
    %10 = vector.load %arg17[%c0_7, %c0_8, %c0_9] : memref<2x8x128xf32, #tpu.memory_space<vmem>>, vector<1x8x128xf32>
    %11 = vector.shape_cast %10 : vector<1x8x128xf32> to vector<8x128xf32>
    %12 = vector.shape_cast %9 : vector<8x128xf32> to vector<1x8x128xf32>
    tpu.vector_store %arg17[%c0_7, %c0_8, %c0_9], %12 {strides = array<i32>} : memref<2x8x128xf32, #tpu.memory_space<vmem>>, vector<1x8x128xf32>,
    %c1 = arith.constant 1 : index
    %c0_10 = arith.constant 0 : index
    %c0_11 = arith.constant 0 : index
    %13 = vector.load %arg17[%c1, %c0_10, %c0_11] : memref<2x8x128xf32, #tpu.memory_space<vmem>>, vector<1x8x128xf32>
    %14 = vector.shape_cast %13 : vector<1x8x128xf32> to vector<8x128xf32>
    %c0_12 = arith.constant 0 : index
    %c0_13 = arith.constant 0 : index
    %15 = vector.load %arg3[%c0_12, %c0_13] : memref<8x512xf32, #tpu.memory_space<vmem>>, vector<8x512xf32>
    %16 = arith.truncf %15 : vector<8x512xf32> to vector<8x512xbf16>
    %c0_14 = arith.constant 0 : index
    %c0_15 = arith.constant 0 : index
    %17 = vector.load %arg12[%c0_14, %c0_15] : memref<512x128xbf16, #tpu.memory_space<vmem>>, vector<512x128xbf16>
    %cst_16 = arith.constant dense<0.000000e+00> : vector<8x128xf32>
    %18 = tpu.matmul %16, %17, %cst_16 {dimension_numbers = #tpu.dot_dimension_numbers<[1], [0], [0], [1], [0, 0, 1, 1], [], []>} : vector<8x512xbf16>, vector<512x128xbf16>, vector<8x128xf32> -> vector<8x128xf32>
    %19 = arith.addf %14, %18 : vector<8x128xf32>
    %c1_17 = arith.constant 1 : index
    %c0_18 = arith.constant 0 : index
    %c0_19 = arith.constant 0 : index
    %20 = vector.load %arg17[%c1_17, %c0_18, %c0_19] : memref<2x8x128xf32, #tpu.memory_space<vmem>>, vector<1x8x128xf32>
    %21 = vector.shape_cast %20 : vector<1x8x128xf32> to vector<8x128xf32>
    %22 = vector.shape_cast %19 : vector<8x128xf32> to vector<1x8x128xf32>
    tpu.vector_store %arg17[%c1_17, %c0_18, %c0_19], %22 {strides = array<i32>} : memref<2x8x128xf32, #tpu.memory_space<vmem>>, vector<1x8x128xf32>,
    %c1_i32 = arith.constant 1 : i32
    %23 = arith.cmpi eq, %arg0, %c1_i32 : i32
    %24 = arith.extui %23 : i1 to i32
    %c0_i32_20 = arith.constant 0 : i32
    %25 = arith.cmpi ne, %24, %c0_i32_20 : i32
    scf.if %25 {
      %c0_21 = arith.constant 0 : index
      %c0_22 = arith.constant 0 : index
      %26 = vector.load %arg1[%c0_21, %c0_22] : memref<8x304xf32, #tpu.memory_space<vmem>>, vector<8x304xf32>
      %27 = arith.truncf %26 : vector<8x304xf32> to vector<8x304xbf16>
      %c0_23 = arith.constant 0 : index
      %c0_24 = arith.constant 0 : index
      %28 = vector.load %arg4[%c0_23, %c0_24] : memref<304x128xbf16, #tpu.memory_space<vmem>>, vector<304x128xbf16>
      %cst_25 = arith.constant dense<0.000000e+00> : vector<8x128xf32>
      %29 = tpu.matmul %27, %28, %cst_25 {dimension_numbers = #tpu.dot_dimension_numbers<[1], [0], [0], [1], [0, 0, 1, 1], [], []>} : vector<8x304xbf16>, vector<304x128xbf16>, vector<8x128xf32> -> vector<8x128xf32>
      %c0_26 = arith.constant 0 : index
      %c0_27 = arith.constant 0 : index
      %30 = vector.load %arg5[%c0_26, %c0_27] : memref<1x128xf32, #tpu.memory_space<vmem>>, vector<1x128xf32>
      %31 = vector.broadcast %30 : vector<1x128xf32> to vector<8x128xf32>
      %32 = arith.addf %29, %31 : vector<8x128xf32>
      %c0_28 = arith.constant 0 : index
      %c0_29 = arith.constant 0 : index
      %c0_30 = arith.constant 0 : index
      %33 = vector.load %arg17[%c0_28, %c0_29, %c0_30] : memref<2x8x128xf32, #tpu.memory_space<vmem>>, vector<1x8x128xf32>
      %34 = vector.shape_cast %33 : vector<1x8x128xf32> to vector<8x128xf32>
      %c0_31 = arith.constant 0 : index
      %c0_32 = arith.constant 0 : index
      %35 = vector.load %arg9[%c0_31, %c0_32] : memref<1x128xf32, #tpu.memory_space<vmem>>, vector<1x128xf32>
      %36 = vector.broadcast %35 : vector<1x128xf32> to vector<8x128xf32>
      %37 = arith.addf %34, %36 : vector<8x128xf32>
      %c1_33 = arith.constant 1 : index
      %c0_34 = arith.constant 0 : index
      %c0_35 = arith.constant 0 : index
      %38 = vector.load %arg17[%c1_33, %c0_34, %c0_35] : memref<2x8x128xf32, #tpu.memory_space<vmem>>, vector<1x8x128xf32>
      %39 = vector.shape_cast %38 : vector<1x8x128xf32> to vector<8x128xf32>
      %c0_36 = arith.constant 0 : index
      %c0_37 = arith.constant 0 : index
      %40 = vector.load %arg13[%c0_36, %c0_37] : memref<1x128xf32, #tpu.memory_space<vmem>>, vector<1x128xf32>
      %41 = vector.broadcast %40 : vector<1x128xf32> to vector<8x128xf32>
      %42 = arith.addf %39, %41 : vector<8x128xf32>
      %cst_38 = arith.constant 0.000000e+00 : f32
      %43 = vector.broadcast %cst_38 : f32 to vector<8x128xf32>
      %44 = arith.maximumf %32, %43 : vector<8x128xf32>
      %45 = arith.truncf %44 : vector<8x128xf32> to vector<8x128xbf16>
      %cst_39 = arith.constant 0.000000e+00 : f32
      %46 = vector.broadcast %cst_39 : f32 to vector<8x128xf32>
      %47 = arith.maximumf %37, %46 : vector<8x128xf32>
      %48 = arith.truncf %47 : vector<8x128xf32> to vector<8x128xbf16>
      %cst_40 = arith.constant 0.000000e+00 : f32
      %49 = vector.broadcast %cst_40 : f32 to vector<8x128xf32>
      %50 = arith.maximumf %42, %49 : vector<8x128xf32>
      %51 = arith.truncf %50 : vector<8x128xf32> to vector<8x128xbf16>
      %c0_41 = arith.constant 0 : index
      %c0_42 = arith.constant 0 : index
      %52 = vector.load %arg6[%c0_41, %c0_42] : memref<128x32xbf16, #tpu.memory_space<vmem>>, vector<128x32xbf16>
      %cst_43 = arith.constant dense<0.000000e+00> : vector<8x32xf32>
      %53 = tpu.matmul %45, %52, %cst_43 {dimension_numbers = #tpu.dot_dimension_numbers<[1], [0], [0], [1], [0, 0, 1, 1], [], []>} : vector<8x128xbf16>, vector<128x32xbf16>, vector<8x32xf32> -> vector<8x32xf32>
      %c0_44 = arith.constant 0 : index
      %c0_45 = arith.constant 0 : index
      %54 = vector.load %arg7[%c0_44, %c0_45] : memref<1x32xf32, #tpu.memory_space<vmem>>, vector<1x32xf32>
      %55 = vector.broadcast %54 : vector<1x32xf32> to vector<8x32xf32>
      %56 = arith.addf %53, %55 : vector<8x32xf32>
      %c0_46 = arith.constant 0 : index
      %c0_47 = arith.constant 0 : index
      %57 = vector.load %arg10[%c0_46, %c0_47] : memref<128x32xbf16, #tpu.memory_space<vmem>>, vector<128x32xbf16>
      %cst_48 = arith.constant dense<0.000000e+00> : vector<8x32xf32>
      %58 = tpu.matmul %48, %57, %cst_48 {dimension_numbers = #tpu.dot_dimension_numbers<[1], [0], [0], [1], [0, 0, 1, 1], [], []>} : vector<8x128xbf16>, vector<128x32xbf16>, vector<8x32xf32> -> vector<8x32xf32>
      %c0_49 = arith.constant 0 : index
      %c0_50 = arith.constant 0 : index
      %59 = vector.load %arg11[%c0_49, %c0_50] : memref<1x32xf32, #tpu.memory_space<vmem>>, vector<1x32xf32>
      %60 = vector.broadcast %59 : vector<1x32xf32> to vector<8x32xf32>
      %61 = arith.addf %58, %60 : vector<8x32xf32>
      %c0_51 = arith.constant 0 : index
      %c0_52 = arith.constant 0 : index
      %62 = vector.load %arg14[%c0_51, %c0_52] : memref<128x32xbf16, #tpu.memory_space<vmem>>, vector<128x32xbf16>
      %cst_53 = arith.constant dense<0.000000e+00> : vector<8x32xf32>
      %63 = tpu.matmul %51, %62, %cst_53 {dimension_numbers = #tpu.dot_dimension_numbers<[1], [0], [0], [1], [0, 0, 1, 1], [], []>} : vector<8x128xbf16>, vector<128x32xbf16>, vector<8x32xf32> -> vector<8x32xf32>
      %c0_54 = arith.constant 0 : index
      %c0_55 = arith.constant 0 : index
      %64 = vector.load %arg15[%c0_54, %c0_55] : memref<1x32xf32, #tpu.memory_space<vmem>>, vector<1x32xf32>
      %65 = vector.broadcast %64 : vector<1x32xf32> to vector<8x32xf32>
      %66 = arith.addf %63, %65 : vector<8x32xf32>
      %cst_56 = arith.constant 0.000000e+00 : f32
      %67 = vector.broadcast %cst_56 : f32 to vector<8x32xf32>
      %68 = tpu.concatenate %56, %61, %66, %67 in 1 : vector<8x32xf32>, vector<8x32xf32>, vector<8x32xf32>, vector<8x32xf32> -> vector<8x128xf32>
      %c0_57 = arith.constant 0 : index
      %c0_58 = arith.constant 0 : index
      %69 = vector.load %arg16[%c0_57, %c0_58] : memref<8x128xf32, #tpu.memory_space<vmem>>, vector<8x128xf32>
      tpu.vector_store %arg16[%c0_57, %c0_58], %68 {strides = array<i32>} : memref<8x128xf32, #tpu.memory_space<vmem>>, vector<8x128xf32>,
    } else {
    }
    return
  }
  func.func @transform_0(%arg0: i32) -> (i32, i32) {
    %c0_i32 = arith.constant 0 : i32
    %c0_i32_0 = arith.constant 0 : i32
    %c0_i32_1 = arith.constant 0 : i32
    return %c0_i32, %c0_i32_0 : i32, i32
  }
  func.func @transform_1(%arg0: i32) -> (i32, i32) {
    %c0_i32 = arith.constant 0 : i32
    %c0_i32_0 = arith.constant 0 : i32
    return %c0_i32, %arg0 : i32, i32
  }
  func.func @transform_2(%arg0: i32) -> (i32, i32) {
    %c0_i32 = arith.constant 0 : i32
    %c0_i32_0 = arith.constant 0 : i32
    return %c0_i32, %arg0 : i32, i32
  }
  func.func @transform_3(%arg0: i32) -> (i32, i32) {
    %c0_i32 = arith.constant 0 : i32
    %c0_i32_0 = arith.constant 0 : i32
    %c0_i32_1 = arith.constant 0 : i32
    return %c0_i32, %c0_i32_0 : i32, i32
  }
  func.func @transform_4(%arg0: i32) -> (i32, i32) {
    %c0_i32 = arith.constant 0 : i32
    %c0_i32_0 = arith.constant 0 : i32
    %c0_i32_1 = arith.constant 0 : i32
    return %c0_i32, %c0_i32_0 : i32, i32
  }
  func.func @transform_5(%arg0: i32) -> (i32, i32) {
    %c0_i32 = arith.constant 0 : i32
    %c0_i32_0 = arith.constant 0 : i32
    %c0_i32_1 = arith.constant 0 : i32
    return %c0_i32, %c0_i32_0 : i32, i32
  }
  func.func @transform_6(%arg0: i32) -> (i32, i32) {
    %c0_i32 = arith.constant 0 : i32
    %c0_i32_0 = arith.constant 0 : i32
    %c0_i32_1 = arith.constant 0 : i32
    return %c0_i32, %c0_i32_0 : i32, i32
  }
  func.func @transform_7(%arg0: i32) -> (i32, i32) {
    %c0_i32 = arith.constant 0 : i32
    %c0_i32_0 = arith.constant 0 : i32
    return %arg0, %c0_i32 : i32, i32
  }
  func.func @transform_8(%arg0: i32) -> (i32, i32) {
    %c0_i32 = arith.constant 0 : i32
    %c0_i32_0 = arith.constant 0 : i32
    %c0_i32_1 = arith.constant 0 : i32
    return %c0_i32, %c0_i32_0 : i32, i32
  }
  func.func @transform_9(%arg0: i32) -> (i32, i32) {
    %c0_i32 = arith.constant 0 : i32
    %c0_i32_0 = arith.constant 0 : i32
    %c0_i32_1 = arith.constant 0 : i32
    return %c0_i32, %c0_i32_0 : i32, i32
  }
  func.func @transform_10(%arg0: i32) -> (i32, i32) {
    %c0_i32 = arith.constant 0 : i32
    %c0_i32_0 = arith.constant 0 : i32
    %c0_i32_1 = arith.constant 0 : i32
    return %c0_i32, %c0_i32_0 : i32, i32
  }
  func.func @transform_11(%arg0: i32) -> (i32, i32) {
    %c0_i32 = arith.constant 0 : i32
    %c0_i32_0 = arith.constant 0 : i32
    return %arg0, %c0_i32 : i32, i32
  }
  func.func @transform_12(%arg0: i32) -> (i32, i32) {
    %c0_i32 = arith.constant 0 : i32
    %c0_i32_0 = arith.constant 0 : i32
    %c0_i32_1 = arith.constant 0 : i32
    return %c0_i32, %c0_i32_0 : i32, i32
  }
  func.func @transform_13(%arg0: i32) -> (i32, i32) {
    %c0_i32 = arith.constant 0 : i32
    %c0_i32_0 = arith.constant 0 : i32
    %c0_i32_1 = arith.constant 0 : i32
    return %c0_i32, %c0_i32_0 : i32, i32
  }
  func.func @transform_14(%arg0: i32) -> (i32, i32) {
    %c0_i32 = arith.constant 0 : i32
    %c0_i32_0 = arith.constant 0 : i32
    %c0_i32_1 = arith.constant 0 : i32
    return %c0_i32, %c0_i32_0 : i32, i32
  }
  func.func @transform_15(%arg0: i32) -> (i32, i32) {
    %c0_i32 = arith.constant 0 : i32
    %c0_i32_0 = arith.constant 0 : i32
    %c0_i32_1 = arith.constant 0 : i32
    return %c0_i32, %c0_i32_0 : i32, i32
  }
}

</mosaic_0001>

<bundles_post_ra>
// kernel: tpu_custom_call.1
= control target key start
LH: loop header
LB: loop body
LE: loop exit
PB: predicated region body
PF: predicated region fallthrough
CT: control target
= control target key end

     0   :  { %s4157_s0 = inlined_call_operand.vmem [shape: f32[8,304], index: 0, kind: input, shape index: {}]   ;;  %s4158_s1 = inlined_call_operand.hbm [shape: f32[8,2048], index: 1, kind: input, shape index: {}]   ;;  %s4159_s2 = inlined_call_operand.vmem [shape: f32[8,1024], index: 2, kind: input, shape index: {}]   ;;  %s4160_s3 = inlined_call_operand.vmem [shape: bf16[304,128], index: 3, kind: input, shape index: {}]   ;;  %s4161_s4 = inlined_call_operand.vmem [shape: f32[1,128], index: 4, kind: input, shape index: {}]   ;;  %s4162_s5 = inlined_call_operand.vmem [shape: bf16[128,32], index: 5, kind: input, shape index: {}]   ;;  %s4163_s6 = inlined_call_operand.hbm [shape: f32[1,32], index: 6, kind: input, shape index: {}]   ;;  %s4164_s7 = inlined_call_operand.hbm [shape: bf16[2048,128], index: 7, kind: input, shape index: {}]   ;;  %s4165_s8 = inlined_call_operand.hbm [shape: f32[1,128], index: 8, kind: input, shape index: {}]   ;;  %s4166_s9 = inlined_call_operand.vmem [shape: bf16[128,32], index: 9, kind: input, shape index: {}]   ;;  %s4167_s10 = inlined_call_operand.hbm [shape: f32[1,32], index: 10, kind: input, shape index: {}]   ;;  %s4168_s11 = inlined_call_operand.hbm [shape: bf16[1024,128], index: 11, kind: input, shape index: {}]   ;;  %s4169_s12 = inlined_call_operand.hbm [shape: f32[1,128], index: 12, kind: input, shape index: {}]   ;;  %s4170_s13 = inlined_call_operand.vmem [shape: bf16[128,32], index: 13, kind: input, shape index: {}]   ;;  %s4171_s14 = inlined_call_operand.vmem [shape: f32[1,32], index: 14, kind: input, shape index: {}]   ;;  %s4172_s15 = inlined_call_operand.hbm [shape: f32[8,128], index: 15, kind: output, shape index: {}]  }
   0x1   :  { %4193 = sst [smem:[#allocation26_spill]] %s4157_s0 }
   0x2   :  { %4194 = sst [smem:[#allocation27_spill]] %s4158_s1 }
   0x3   :  { %4195 = sst [smem:[#allocation28_spill]] %s4159_s2 }
   0x4   :  { %4196 = sst [smem:[#allocation29_spill]] %s4160_s3 }
   0x5   :  { %4197 = sst [smem:[#allocation30_spill]] %s4161_s4 }
   0x6   :  { %4198 = sst [smem:[#allocation31_spill]] %s4162_s5 }
   0x7   :  { %4199 = sst [smem:[#allocation32_spill]] %s4163_s6 }
   0x8   :  { %4200 = sst [smem:[#allocation33_spill]] %s4166_s9 }
   0x9   :  { %4201 = sst [smem:[#allocation34_spill]] %s4170_s13 }
   0xa   :  { %4202 = sst [smem:[#allocation35_spill]] %s4171_s14 }
   0xb   :  { %4203 = sst [smem:[#allocation36_spill]] %s4172_s15 }
   0xc   :  { %20 = vsyncpa [#allocation4], 0 }
   0xd   :  { %22 = vsyncpa [#allocation4 + $0x1], 0 }
   0xe   :  { %23 = vsyncpa [#allocation7], 0 }
   0xf   :  { %24 = vsyncpa [#allocation11], 0 }
  0x10   :  { %25 = vsyncpa [#allocation5], 0  ;;  %s3532_s18 = smov 0   ;;  %s3534_s19 = smov 0  }
  0x11   :  { %s3536_s20 = smov 0   ;;  %s3538_s21 = smov 0  }
  0x12 LB: > { %4204 = sst [smem:[#allocation23_spill]] %s3431_s20  ;;  %s3437_s22 = smov [#allocation6]   ;;  %s3435_s21 = sphi %s3538_s21, %s4243_s21   ;;  %s3431_s20 = sphi %s3536_s20, %s4248_s20   ;;  %s3427_s19 = sphi %s3534_s19, %s4247_s19   ;;  %s3423_s18 = sphi %s3532_s18, %s4246_s18  }
  0x13   : > { %s417_s23 = sshll.u32 %s3437_s22, 4  ;;  %s3553_s24 = sadd.s32 4294967295, %s3435_s21   ;;  %s418_s23 = int_to_ptr.vmem [resolvable:$true] %s417_s23 }
  0x14   : > { %p2467_p0 = scmp.ge.s32.totalorder %s3435_s21, 1  ;;  %p4175_p1 = scmp.eq.s32.totalorder %s3553_s24, 0 }
  0x15   : > { %p392_p2 = scmp.lt.s32.totalorder %s3435_s21, 3  ;;  %s3572_s27 = sadd.s32 1, %s3435_s21  }
  0x16   : > { %4207 = sst [smem:[#allocation24_spill]] %s3572_s27  ;;  %s59_s28 = sadd.s32 1, %s3431_s20 }
  0x17   : > { %p3559_p4 = pnand %p2467_p0, %p392_p2  ;;  %s56_s29 = ssub.s32 %s3435_s21, %s3572_s27 }
  0x18   : > { %s4208_s6 = sld [smem:[#allocation32_spill]] }
  0x19   : > { %s4205_s25 = scalar_select %p3559_p4, 1, 0 }
  0x1a   : > { %p2928_p5 = pneg %p3559_p4 }
  0x1c   : > { %p3567_p6 = pnand %p2928_p5, %p4175_p1 }
  0x1e   : > { %s4206_s26 = scalar_select %p3567_p6, 1, 0 }
  0x1f   : > { %s3145_s17 = scalar_lea.hbm %s4208_s6, 16  ;;  %p3585_p8 = pneg %p3567_p6 }
  0x20   : > { %p3146_p7 = scmp.ne.s32.totalorder %s4208_s6, %s3145_s17  ;;  %p3152_p11 = scmp.lt.u32.totalorder %s3145_s17, %s4208_s6 }
  0x21   : > { %s4209_s14 = scalar_select %p3585_p8, 1, 0 }
  0x22   : > { %p3148_p9 = pnand %p3585_p8, %p3146_p7 }
  0x24   : > { %p3149_p10 = pneg %p3148_p9 }
  0x26   : > { %p3154_p12 = pnand %p3152_p11, %p3149_p10 }
  0x28   : > { %3157 = shalt.err (!%p3154_p12)
}
  0x29   : > { %s3158_s30 = scalar_lea.vmem %s418_s23, 16  ;;  %s3165_s15 = scalar_lea.vmem %s418_s23, 32 }
  0x2a   : > { %p3159_p13 = scmp.ne.s32.totalorder %s418_s23, %s3158_s30  ;;  %p3166_p5 = scmp.lt.s32.totalorder %s418_s23, %s418_s23 }
  0x2b   : > { %p3167_p3 = scmp.lt.s32.totalorder %s3165_s15, %s3158_s30 }
  0x2c   : > { %p3161_p0 = pnand %p3159_p13, %p3585_p8 }
  0x2d   : > { %p3168_p1 = por %p3167_p3, %p3166_p5 }
  0x2e   : > { %p3162_p2 = pneg %p3161_p0 }
  0x30   : > { %p3169_p4 = pnand %p3168_p1, %p3162_p2 }
  0x32   : > { %3172 = shalt.err (!%p3169_p4)
}
  0x33   : > { %2931 = dma.hbm_to_vmem [thread:$0]  (!%p3567_p6), %s4208_s6, 16, %s418_s23, [#allocation7]  }
  0x34   : > { %p57_p3 = scmp.eq.s32.totalorder %s56_s29, 0  ;;  %p66_p1 = scmp.ne.s32.totalorder %s3431_s20, %s3427_s19 }
  0x35   : > { %p67_p4 = scmp.eq.s32.totalorder %s3435_s21, 0  ;;  %p72_p7 = scmp.ne.s32.totalorder %s3427_s19, %s3423_s18 }
  0x36   : > { %s3607_s4 = scalar_select %p57_p3, %s3431_s20, %s59_s28  }
  0x37   : > { %p68_p9 = por %p67_p4, %p66_p1  ;;  %p4211_p10 = scmp.eq.s32.totalorder %s3553_s24, 0 }
  0x38   : > { %4210 = sst [smem:[#allocation25_spill]] %s3607_s4  ;;  %p2955_p12 = scmp.lt.s32.totalorder %s3435_s21, 2 }
  0x39   : > { %p3611_p11 = por %p4211_p10, %p72_p7  ;;  %s470_s17 = sand.u32 1, %s3435_s21  }
  0x3a   : > { %s3618_s30 = sand.u32 1, %s3431_s20   ;;  %s2644_s23 = sshll.u32 %s3435_s21, 10 }
  0x3b   : > { %s4212_s13 = scalar_select %p3611_p11, 1, 0 }
  0x3c   : > { %s2473_s15 = sshll.u32 %s3618_s30, 6  ;;  %s4213_s1 = sld [smem:[#allocation27_spill]] }
  0x3d   : > { %s474_s28 = scalar_lea.vmem [#allocation3], %s2473_s15  ;;  %p3627_p13 = pnand %p2955_p12, %p68_p9 }
  0x3e   : > { %s482_s22 = sshll.u32 %s474_s28, 4  ;;  %s2476_s4 = sshll.u32 %s3618_s30, 9  ;;  %s3631_s22 = int_to_ptr.vmem [resolvable:$true] %s482_s22 }
  0x3f   : > { %s4214_s6 = scalar_select %p3627_p13, 1, 0 }
  0x40   : > { %s3634_s20 = scalar_lea.sflag [#allocation4], %s470_s17  ;;  %p3640_p2 = pneg %p3627_p13 }
  0x42   : > { %s3625_s18 = scalar_lea.hbm %s4213_s1, %s2644_s23  ;;  %s3178_s16 = scalar_lea.hbm %s4213_s1, 2048 }
  0x43   : > { %s3173_s27 = scalar_lea.hbm %s3625_s18, 1024  ;;  %p3179_p1 = scmp.lt.u32.totalorder %s3625_s18, %s4213_s1 }
  0x44   : > { %p3174_p0 = scmp.ne.s32.totalorder %s3625_s18, %s3173_s27  ;;  %p3180_p4 = scmp.lt.u32.totalorder %s3178_s16, %s3173_s27 }
  0x45   : > { %s4215_s23 = scalar_select %p3640_p2, 1, 0 }
  0x46   : > { %p3176_p5 = pnand %p3640_p2, %p3174_p0  ;;  %p3181_p7 = por %p3180_p4, %p3179_p1 }
  0x47   : > { %p3182_p9 = scmp.lt.u32.totalorder %s3173_s27, %s3625_s18 }
  0x48   : > { %p3177_p3 = pneg %p3176_p5 }
  0x49   : > { %p3183_p10 = por %p3182_p9, %p3181_p7 }
  0x4b   : > { %p3184_p12 = pnand %p3183_p10, %p3177_p3 }
  0x4d   : > { %3187 = shalt.err (!%p3184_p12)
}
  0x4e   : > { %s3188_s17 = scalar_lea.vmem %s3631_s22, 1024  ;;  %s3438_s15 = smov [#allocation3]  }
  0x4f   : > { %p3189_p0 = scmp.ne.s32.totalorder %s3631_s22, %s3188_s17  ;;  %s3193_s29 = sshll.u32 %s3438_s15, 4  ;;  %s3194_s29 = int_to_ptr.vmem [resolvable:$false] %s3193_s29 }
  0x50   : > { %s3195_s9 = scalar_lea.vmem %s3194_s29, 2048  ;;  %p3196_p6 = scmp.lt.s32.totalorder %s3631_s22, %s3194_s29 }
  0x51   : > { %p3191_p5 = pnand %p3189_p0, %p3640_p2  ;;  %p3197_p8 = scmp.lt.s32.totalorder %s3195_s9, %s3188_s17 }
  0x53   : > { %p3192_p11 = pneg %p3191_p5  ;;  %p3198_p1 = por %p3197_p8, %p3196_p6 }
  0x55   : > { %p3199_p4 = pnand %p3198_p1, %p3192_p11 }
  0x57   : > { %3202 = shalt.err (!%p3199_p4)
}
  0x58   : > { %2944 = dma.hbm_to_vmem [thread:$0]  (!%p3627_p13), %s3625_s18, 1024, %s3631_s22, %s3634_s20  }
  0x59   : > { %s502_s27 = scalar_lea.vmem [#allocation8], %s2476_s4  ;;  %s2479_s28 = sshll.u32 %s3618_s30, 8 }
  0x5a   : > { %s509_s16 = sshll.u32 %s502_s27, 4  ;;  %s523_s17 = scalar_lea.vmem [#allocation12], %s2479_s28  ;;  %s3667_s16 = int_to_ptr.vmem [resolvable:$true] %s509_s16 }
  0x5b   : > { %s530_s15 = sshll.u32 %s523_s17, 4  ;;  %s3439_s29 = smov [#allocation9]   ;;  %s3669_s15 = int_to_ptr.vmem [resolvable:$true] %s530_s15 }
  0x5c   : > { %s428_s9 = sshll.u32 %s3439_s29, 4  ;;  %s2645_s1 = sshll.u32 %s3435_s21, 13  ;;  %s429_s9 = int_to_ptr.vmem [resolvable:$true] %s428_s9 }
  0x5d   : > { %s3203_s3 = scalar_lea.hbm %s4165_s8, 16  ;;  %p4216_p8 = scmp.ne.s32.totalorder %s4209_s14, 0 }
  0x5e   : > { %p3204_p6 = scmp.ne.s32.totalorder %s4165_s8, %s3203_s3  ;;  %p3210_p7 = scmp.lt.u32.totalorder %s3203_s3, %s4165_s8 }
  0x60   : > { %p3206_p11 = pnand %p3204_p6, %p4216_p8 }
  0x62   : > { %p3207_p3 = pneg %p3206_p11 }
  0x64   : > { %p3212_p9 = pnand %p3210_p7, %p3207_p3 }
  0x66   : > { %3215 = shalt.err (!%p3212_p9)
}
  0x67   : > { %s3216_s22 = scalar_lea.vmem %s429_s9, 16  ;;  %s3223_s0 = scalar_lea.vmem %s429_s9, 32 }
  0x68   : > { %p3217_p10 = scmp.ne.s32.totalorder %s429_s9, %s3216_s22  ;;  %p3224_p5 = scmp.lt.s32.totalorder %s429_s9, %s429_s9 }
  0x69   : > { %p3225_p1 = scmp.lt.s32.totalorder %s3223_s0, %s3216_s22 }
  0x6a   : > { %p3219_p12 = pnand %p3217_p10, %p4216_p8 }
  0x6b   : > { %p3226_p4 = por %p3225_p1, %p3224_p5 }
  0x6c   : > { %p3220_p0 = pneg %p3219_p12 }
  0x6e   : > { %p3227_p13 = pnand %p3226_p4, %p3220_p0 }
  0x70   : > { %3230 = shalt.err (!%p3227_p13)
}
  0x71   : > { %p4217_p6 = scmp.ne.s32.totalorder %s4206_s26, 0  ;;  %s3693_s28 = scalar_lea.hbm %s4164_s7, %s2645_s1 }
  0x72   : > { %s3231_s17 = scalar_lea.hbm %s3693_s28, 8192  ;;  %s3236_s4 = scalar_lea.hbm %s4164_s7, 16384 }
  0x73   : > { %2934 = dma.hbm_to_vmem [thread:$0]  (!%p4217_p6), %s4165_s8, 16, %s429_s9, [#allocation7]  }
  0x74   : > { %p3232_p11 = scmp.ne.s32.totalorder %s3693_s28, %s3231_s17  ;;  %p3237_p7 = scmp.lt.u32.totalorder %s3693_s28, %s4164_s7 }
  0x75   : > { %p3238_p9 = scmp.lt.u32.totalorder %s3236_s4, %s3231_s17  ;;  %p3240_p12 = scmp.lt.u32.totalorder %s3231_s17, %s3693_s28 }
  0x76   : > { %p3234_p13 = pnand %p3232_p11, %p3640_p2 }
  0x77   : > { %p3239_p10 = por %p3238_p9, %p3237_p7 }
  0x78   : > { %p3235_p3 = pneg %p3234_p13 }
  0x79   : > { %p3241_p0 = por %p3240_p12, %p3239_p10 }
  0x7b   : > { %p3242_p5 = pnand %p3241_p0, %p3235_p3 }
  0x7d   : > { %3245 = shalt.err (!%p3242_p5)
}
  0x7e   : > { %s3246_s1 = scalar_lea.vmem %s3667_s16, 8192  ;;  %s3440_s22 = smov [#allocation8]  }
  0x7f   : > { %p3247_p1 = scmp.ne.s32.totalorder %s3667_s16, %s3246_s1  ;;  %s3251_s0 = sshll.u32 %s3440_s22, 4  ;;  %s3252_s0 = int_to_ptr.vmem [resolvable:$false] %s3251_s0 }
  0x80   : > { %s3253_s2 = scalar_lea.vmem %s3252_s0, 16384  ;;  %p3254_p13 = scmp.lt.s32.totalorder %s3667_s16, %s3252_s0 }
  0x81   : > { %p3249_p4 = pnand %p3247_p1, %p3640_p2  ;;  %p3255_p6 = scmp.lt.s32.totalorder %s3253_s2, %s3246_s1 }
  0x83   : > { %p3250_p11 = pneg %p3249_p4  ;;  %p3256_p7 = por %p3255_p6, %p3254_p13 }
  0x85   : > { %p3257_p9 = pnand %p3256_p7, %p3250_p11 }
  0x87   : > { %3260 = shalt.err (!%p3257_p9)
}
  0x88   : > { %s3441_s5 = smov 64   ;;  %s3442_s3 = smov 4  }
  0x89   : > { %p4218_p3 = scmp.ne.s32.totalorder %s4214_s6, 0  ;;  %s3443_s27 = smov [#allocation10]  }
  0x8a   : > { %s442_s17 = sshll.u32 %s3443_s27, 4  ;;  %s3444_s29 = smov [#allocation13]   ;;  %s443_s17 = int_to_ptr.vmem [resolvable:$true] %s442_s17 }
  0x8b   : > { %2947 = dma.hbm_to_vmem [thread:$0]  (!%p4218_p3), %s3693_s28, 8192, %s3667_s16, %s3634_s20, %s3441_s5, %s3441_s5, %s3442_s3  }
  0x8c   : > { %s453_s18 = sshll.u32 %s3444_s29, 4  ;;  %s3261_s9 = scalar_lea.hbm %s4167_s10, 16  ;;  %s454_s18 = int_to_ptr.vmem [resolvable:$true] %s453_s18 }
  0x8d   : > { %p3262_p6 = scmp.ne.s32.totalorder %s4167_s10, %s3261_s9  ;;  %p3268_p0 = scmp.lt.u32.totalorder %s3261_s9, %s4167_s10 }
  0x8f   : > { %p3264_p10 = pnand %p3262_p6, %p4216_p8 }
  0x91   : > { %p3265_p12 = pneg %p3264_p10 }
  0x93   : > { %p3270_p5 = pnand %p3268_p0, %p3265_p12 }
  0x95   : > { %3273 = shalt.err (!%p3270_p5)
}
  0x96   : > { %s3274_s16 = scalar_lea.vmem %s443_s17, 16  ;;  %s3281_s28 = scalar_lea.vmem %s443_s17, 32 }
  0x97   : > { %p3275_p1 = scmp.ne.s32.totalorder %s443_s17, %s3274_s16  ;;  %p3282_p13 = scmp.lt.s32.totalorder %s443_s17, %s443_s17 }
  0x98   : > { %p3283_p7 = scmp.lt.s32.totalorder %s3281_s28, %s3274_s16 }
  0x99   : > { %p3277_p4 = pnand %p3275_p1, %p4216_p8 }
  0x9a   : > { %p3284_p9 = por %p3283_p7, %p3282_p13 }
  0x9b   : > { %p3278_p11 = pneg %p3277_p4 }
  0x9d   : > { %p3285_p3 = pnand %p3284_p9, %p3278_p11 }
  0x9f   : > { %3288 = shalt.err (!%p3285_p3)
}
  0xa0   : > { %p4219_p6 = scmp.ne.s32.totalorder %s4206_s26, 0  ;;  %s2646_s4 = sshll.u32 %s3435_s21, 12 }
  0xa1   : > { %s3289_s1 = scalar_lea.hbm %s4169_s12, 16 }
  0xa2   : > { %2937 = dma.hbm_to_vmem [thread:$0]  (!%p4219_p6), %s4167_s10, 16, %s443_s17, [#allocation11]  }
  0xa3   : > { %p3290_p10 = scmp.ne.s32.totalorder %s4169_s12, %s3289_s1  ;;  %p3296_p0 = scmp.lt.u32.totalorder %s3289_s1, %s4169_s12 }
  0xa5   : > { %p3292_p3 = pnand %p3290_p10, %p4216_p8 }
  0xa7   : > { %p3293_p12 = pneg %p3292_p3 }
  0xa9   : > { %p3298_p5 = pnand %p3296_p0, %p3293_p12 }
  0xab   : > { %3301 = shalt.err (!%p3298_p5)
}
  0xac   : > { %s3302_s17 = scalar_lea.vmem %s454_s18, 16  ;;  %s3309_s21 = scalar_lea.vmem %s454_s18, 32 }
  0xad   : > { %p3303_p1 = scmp.ne.s32.totalorder %s454_s18, %s3302_s17  ;;  %p3310_p13 = scmp.lt.s32.totalorder %s454_s18, %s454_s18 }
  0xae   : > { %p3311_p7 = scmp.lt.s32.totalorder %s3309_s21, %s3302_s17 }
  0xaf   : > { %p3305_p4 = pnand %p3303_p1, %p4216_p8 }
  0xb0   : > { %p3312_p9 = por %p3311_p7, %p3310_p13 }
  0xb1   : > { %p3306_p11 = pneg %p3305_p4 }
  0xb3   : > { %p3313_p2 = pnand %p3312_p9, %p3306_p11 }
  0xb5   : > { %3316 = shalt.err (!%p3313_p2)
}
  0xb6   : > { %2940 = dma.hbm_to_vmem [thread:$0]  (!%p4219_p6), %s4169_s12, 16, %s454_s18, [#allocation7]  }
  0xb7   : > { %s3760_s9 = scalar_lea.hbm %s4168_s11, %s2646_s4  ;;  %p4220_p10 = scmp.ne.s32.totalorder %s4215_s23, 0 }
  0xb8   : > { %s3317_s14 = scalar_lea.hbm %s3760_s9, 4096  ;;  %s3322_s22 = scalar_lea.hbm %s4168_s11, 8192 }
  0xb9   : > { %p3318_p8 = scmp.ne.s32.totalorder %s3760_s9, %s3317_s14  ;;  %p3323_p6 = scmp.lt.u32.totalorder %s3760_s9, %s4168_s11 }
  0xba   : > { %p3324_p12 = scmp.lt.u32.totalorder %s3322_s22, %s3317_s14  ;;  %p3326_p5 = scmp.lt.u32.totalorder %s3317_s14, %s3760_s9 }
  0xbb   : > { %p3320_p2 = pnand %p3318_p8, %p4220_p10 }
  0xbc   : > { %p3325_p0 = por %p3324_p12, %p3323_p6 }
  0xbd   : > { %p3321_p3 = pneg %p3320_p2 }
  0xbe   : > { %p3327_p1 = por %p3326_p5, %p3325_p0 }
  0xc0   : > { %p3328_p4 = pnand %p3327_p1, %p3321_p3 }
  0xc2   : > { %3331 = shalt.err (!%p3328_p4)
}
  0xc3   : > { %s3332_s4 = scalar_lea.vmem %s3669_s15, 4096  ;;  %s3445_s2 = smov [#allocation12]  }
  0xc4   : > { %p3333_p11 = scmp.ne.s32.totalorder %s3669_s15, %s3332_s4  ;;  %s3337_s16 = sshll.u32 %s3445_s2, 4  ;;  %s3338_s16 = int_to_ptr.vmem [resolvable:$false] %s3337_s16 }
  0xc5   : > { %s3339_s17 = scalar_lea.vmem %s3338_s16, 8192  ;;  %p3340_p9 = scmp.lt.s32.totalorder %s3669_s15, %s3338_s16 }
  0xc6   : > { %p3335_p13 = pnand %p3333_p11, %p4220_p10  ;;  %p3341_p8 = scmp.lt.s32.totalorder %s3339_s17, %s3332_s4 }
  0xc8   : > { %p3336_p7 = pneg %p3335_p13  ;;  %p3342_p2 = por %p3341_p8, %p3340_p9 }
  0xca   : > { %p3343_p6 = pnand %p3342_p2, %p3336_p7 }
  0xcc   : > { %3346 = shalt.err (!%p3343_p6)
}
  0xcd   : > { %p4221_p3 = scmp.ne.s32.totalorder %s4214_s6, 0  ;;  %p4222_p10 = scmp.ne.s32.totalorder %s4205_s25, 0 }
  0xce   : > { %s544_s23 = sand.u32 (!%p4222_p10), 1, %s3553_s24   ;;  %s546_s21 = sand.u32 (!%p4222_p10), 1, %s3427_s19  }
  0xcf   : > { %2950 = dma.hbm_to_vmem [thread:$0]  (!%p4221_p3), %s3760_s9, 4096, %s3669_s15, %s3634_s20, %s3441_s5, %s3441_s5, %s3442_s3  }
  0xd0   : > { %542 = sbr.rel (%p4222_p10) target bundleno = 1111 (0x457), region = 80  ;;  %s2483_s28 = sshll.u32 (!%p4222_p10), %s546_s21, 6 }
  0xd1   : > { %s545_s27 = scalar_lea.sflag (!%p4222_p10), [#allocation4], %s544_s23  ;;  %s3791_s29 = scalar_lea.vmem (!%p4222_p10), [#allocation3], %s2483_s28 }
  0xd2   : > { %p4223_p12 = scmp.ne.s32.totalorder (!%p4222_p10), %s4212_s13, 0 }
  0xd7   : > { %3390 = dma.done.wait (%p4223_p12), %s545_s27, 1024  }
  0xd8   : > { %3392 = vsyncadd (%p4223_p12), %s545_s27, 4294966272  ;;  %p4224_p0 = scmp.eq.s32.totalorder %s3553_s24, 0 }
  0xda   : > { %3394 = dma.done.wait (%p4224_p0), [#allocation7], 16   ;;  %p4225_p5 = pmov %p4224_p0 }
  0xdb   : > { %s2485_s6 = sshll.u32 %s546_s21, 9 }
  0xdc   : > { %3396 = vsyncadd (%p4225_p5), [#allocation7], 4294967280  ;;  %s3801_s20 = scalar_lea.vmem [#allocation8], %s2485_s6 }
  0xdd   : > { %3398 = dma.done.wait (%p4223_p12), %s545_s27, 8192  }
  0xde   : > { %3400 = vsyncadd (%p4223_p12), %s545_s27, 4294959104  ;;  %p4226_p1 = pmov %p4224_p0 }
  0xdf   : > { %p4227_p4 = pmov %p4224_p0 }
  0xe0   : > { %3402 = dma.done.wait (%p4226_p1), [#allocation7], 16  }
  0xe1   : > { %3404 = vsyncadd (%p4227_p4), [#allocation7], 4294967280  ;;  %p4228_p11 = pmov %p4224_p0 }
  0xe2   : > { %p4229_p13 = pmov %p4224_p0 }
  0xe3   : > { %3406 = dma.done.wait (%p4228_p11), [#allocation11], 16  }
  0xe4   : > { %3408 = vsyncadd (%p4229_p13), [#allocation11], 4294967280  ;;  %s2488_s25 = sshll.u32 %s546_s21, 8 }
  0xe5   : > { %s3815_s15 = scalar_lea.vmem [#allocation12], %s2488_s25 }
  0xe6   : > { %3410 = dma.done.wait (%p4223_p12), %s545_s27, 4096  }
  0xe7   : > { %3412 = vsyncadd (%p4223_p12), %s545_s27, 4294963200  ;;  %p4230_p7 = pmov %p4224_p0 }
  0xe8   : > { %p4231_p9 = pmov %p4224_p0 }
  0xe9   : > { %3414 = dma.done.wait (%p4230_p7), [#allocation7], 16  }
  0xea   : > { %3416 = vsyncadd (%p4231_p9), [#allocation7], 4294967280  ;;  %s2490_s5 = sshll.u32 %s3553_s24, 2  ;;  %s4232_s14 = sld [smem:[#allocation28_spill]] }
  0xeb   : > { %p641_p8 = scmp.lt.s32.totalorder %s2490_s5, 7  ;;  %p4233_p2 = scmp.ne.s32.totalorder %s3553_s24, 0 }
  0xec   : > { %v3446_v0 = vmov (!%p4233_p2), 0.0  }
  0xed   : > { %s4250_s5 = smov (!%p641_p8, %s2490_s5), 7  ;;  %652 = sbr.rel (%p4233_p2) target bundleno = 244 (0xf4), region = 112 }
  0xee   : > { %s2491_s3 = sshll.u32 %s4250_s5, 3  ;;  %653 = vst [vmem:[#allocation2] sm:$0xff] (!%p4233_p2), %v3446_v0  ;;  %654 = vst [vmem:[#allocation2 + $0x8] sm:$0xff] (!%p4233_p2), %v3446_v0 }
  0xf0   : > { %s3829_s26 = scalar_lea.vmem %s4232_s14, %s2491_s3 }
  0xf4 PF: > { %v3006_v1 = vld [vmem:[%s3801_s20 + $0x40] sm:$0xff]   ;;  %v3010_v5 = vld [vmem:[%s3801_s20 + $0x48] sm:$0xff]   ;;  %v3014_v9 = vld [vmem:[%s3801_s20 + $0x50] sm:$0xff]   ;;  %p2589_p6 = scmp.ne.s32.totalorder %s3553_s24, 1 }
  0xf5   : > { %v3007_v2 = vld [vmem:[%s3801_s20 + $0xc0] sm:$0xff]   ;;  %2647 = vmatprep.subr.bf16.mxu0 %v3006_v1  ;;  %v3011_v6 = vld [vmem:[%s3801_s20 + $0xc8] sm:$0xff]   ;;  %v3015_v10 = vld [vmem:[%s3801_s20 + $0xd0] sm:$0xff]   ;;  %s4234_s22 = sld [smem:[#allocation29_spill]] (!%p2589_p6)  ;;  %vm3448_vm0 = vmmov (!%p2589_p6), 0   ;;  %s4235_s2 = sld [smem:[#allocation26_spill]] (!%p2589_p6) }
  0xf6   : > { %v3008_v3 = vld [vmem:[%s3801_s20] sm:$0xff]   ;;  %2669 = vmatprep.subr.bf16.mxu1 %v3007_v2  ;;  %v3012_v7 = vld [vmem:[%s3801_s20 + $0x8] sm:$0xff]   ;;  %v3016_v11 = vld [vmem:[%s3801_s20 + $0x10] sm:$0xff]   ;;  %vm1863_vm1 = vcmask (!%p2589_p6), 392192   ;;  %s4236_s1 = sld [smem:[#allocation31_spill]] (!%p2589_p6)  ;;  %s4237_s4 = sld [smem:[#allocation33_spill]] (!%p2589_p6) }
  0xf7   : > { %v3009_v4 = vld [vmem:[%s3801_s20 + $0x80] sm:$0xff]   ;;  %2648 = vmatpush3.bf16.msra.mxu0 %v3008_v3  ;;  %v3013_v8 = vld [vmem:[%s3801_s20 + $0x88] sm:$0xff]   ;;  %v3017_v12 = vld [vmem:[%s3801_s20 + $0x90] sm:$0xff]   ;;  %s4239_s30 = sld [smem:[#allocation34_spill]] (!%p2589_p6)  ;;  %s4240_s5 = sld [smem:[#allocation35_spill]] (!%p2589_p6)  ;;  %vm2312_vm2 = vcmask (!%p2589_p6), 261120  }
  0xf8   : > { %2670 = vmatpush3.bf16.msra.mxu1 %v3009_v4  ;;  %2649 = vmatprep.subr.bf16.mxu0 %v3010_v5  ;;  %v3018_v13 = vld [vmem:[%s3801_s20 + $0x58] sm:$0xff]   ;;  %v3022_v17 = vld [vmem:[%s3801_s20 + $0x60] sm:$0xff]   ;;  %v3026_v21 = vld [vmem:[%s3801_s20 + $0x68] sm:$0xff]   ;;  %s3450_s3 = smov (!%p2589_p6), 64   ;;  %vm2314_vm3 = vcmask (!%p2589_p6), 523264   ;;  %vm2316_vm4 = vcmask (!%p2589_p6), 785408  }
  0xf9   : > { %2671 = vmatprep.subr.bf16.mxu1 %v3011_v6  ;;  %v3019_v14 = vld [vmem:[%s3801_s20 + $0xd8] sm:$0xff]   ;;  %v3023_v18 = vld [vmem:[%s3801_s20 + $0xe0] sm:$0xff]   ;;  %v3027_v22 = vld [vmem:[%s3801_s20 + $0xe8] sm:$0xff]  }
  0xfa   : > { %v3020_v15 = vld [vmem:[%s3801_s20 + $0x18] sm:$0xff]   ;;  %v3024_v19 = vld [vmem:[%s3801_s20 + $0x20] sm:$0xff]   ;;  %v3028_v23 = vld [vmem:[%s3801_s20 + $0x28] sm:$0xff]  }
  0xfb   : > { %2650 = vmatpush3.bf16.msra.mxu0 %v3012_v7  ;;  %v3021_v16 = vld [vmem:[%s3801_s20 + $0x98] sm:$0xff]   ;;  %v3025_v20 = vld [vmem:[%s3801_s20 + $0xa0] sm:$0xff]   ;;  %v3029_v24 = vld [vmem:[%s3801_s20 + $0xa8] sm:$0xff]  }
  0xfc   : > { %2672 = vmatpush3.bf16.msra.mxu1 %v3013_v8  ;;  %2651 = vmatprep.subr.bf16.mxu0 %v3014_v9  ;;  %v3030_v25 = vld [vmem:[%s3801_s20 + $0x70] sm:$0xff]   ;;  %v3034_v29 = vld [vmem:[%s3801_s20 + $0x78] sm:$0xff]   ;;  %v657_v33 = vld [vmem:[%s3791_s29 + $0x8] sm:$0xff] }
  0xfd   : > { %2673 = vmatprep.subr.bf16.mxu1 %v3015_v10  ;;  %v3031_v26 = vld [vmem:[%s3801_s20 + $0xf0] sm:$0xff]   ;;  %v3035_v30 = vld [vmem:[%s3801_s20 + $0xf8] sm:$0xff]   ;;  %v665_v36 = vpack.c.bf16 %v657_v33, %v657_v33  ;;  %v3038_v41 = vld [vmem:[%s3801_s20 + $0x140] sm:$0xff]  }
  0xfe   : > { %v3032_v27 = vld [vmem:[%s3801_s20 + $0x30] sm:$0xff]   ;;  %v3036_v31 = vld [vmem:[%s3801_s20 + $0x38] sm:$0xff]   ;;  %v3039_v42 = vld [vmem:[%s3801_s20 + $0x1c0] sm:$0xff]  }
  0xff   : > { %2652 = vmatpush3.bf16.msra.mxu0 %v3016_v11  ;;  %v3033_v28 = vld [vmem:[%s3801_s20 + $0xb0] sm:$0xff]   ;;  %v3037_v32 = vld [vmem:[%s3801_s20 + $0xb8] sm:$0xff]   ;;  %1216 = vmatprep.mubr.bf16.mxu0 %v665_v36  ;;  %v3040_v43 = vld [vmem:[%s3801_s20 + $0x100] sm:$0xff]  }
 0x100   : > { %2674 = vmatpush3.bf16.msra.mxu1 %v3017_v12  ;;  %2653 = vmatprep.subr.bf16.mxu0 %v3018_v13  ;;  %v659_v34 = vld [vmem:[%s3791_s29 + $0x18] sm:$0xff]  ;;  %v656_v35 = vld [vmem:[%s3791_s29] sm:$0xff]  ;;  %v658_v39 = vld [vmem:[%s3791_s29 + $0x10] sm:$0xff] }
 0x101   : > { %2675 = vmatprep.subr.bf16.mxu1 %v3019_v14  ;;  %v667_v37 = vpack.c.bf16 %v659_v34, %v659_v34  ;;  %v664_v38 = vpack.c.bf16 %v656_v35, %v656_v35  ;;  %v666_v40 = vpack.c.bf16 %v658_v39, %v658_v39  ;;  %v3041_v44 = vld [vmem:[%s3801_s20 + $0x180] sm:$0xff]   ;;  %v3042_v45 = vld [vmem:[%s3801_s20 + $0x148] sm:$0xff]   ;;  %v3046_v49 = vld [vmem:[%s3801_s20 + $0x150] sm:$0xff]  }
 0x102   : > { %v3043_v46 = vld [vmem:[%s3801_s20 + $0x1c8] sm:$0xff]   ;;  %v3047_v50 = vld [vmem:[%s3801_s20 + $0x1d0] sm:$0xff]   ;;  %v3050_v53 = vld [vmem:[%s3801_s20 + $0x158] sm:$0xff]  }
 0x103   : > { %2654 = vmatpush3.bf16.msra.mxu0 %v3020_v15  ;;  %1256 = vmatprep.mubr.bf16.mxu1 %v667_v37  ;;  %v3044_v47 = vld [vmem:[%s3801_s20 + $0x108] sm:$0xff]   ;;  %v3048_v51 = vld [vmem:[%s3801_s20 + $0x110] sm:$0xff]   ;;  %v3051_v54 = vld [vmem:[%s3801_s20 + $0x1d8] sm:$0xff]  }
 0x104   : > { %2676 = vmatpush3.bf16.msra.mxu1 %v3021_v16  ;;  %2655 = vmatprep.subr.bf16.mxu0 %v3022_v17  ;;  %v3045_v48 = vld [vmem:[%s3801_s20 + $0x188] sm:$0xff]   ;;  %v3049_v52 = vld [vmem:[%s3801_s20 + $0x190] sm:$0xff]   ;;  %v3052_v55 = vld [vmem:[%s3801_s20 + $0x118] sm:$0xff]  }
 0x105   : > { %2677 = vmatprep.subr.bf16.mxu1 %v3023_v18  ;;  %v3053_v56 = vld [vmem:[%s3801_s20 + $0x198] sm:$0xff]   ;;  %v3054_v57 = vld [vmem:[%s3801_s20 + $0x160] sm:$0xff]   ;;  %v3058_v61 = vld [vmem:[%s3801_s20 + $0x168] sm:$0xff]  }
 0x106   : > { %v3055_v58 = vld [vmem:[%s3801_s20 + $0x1e0] sm:$0xff]   ;;  %v3059_v62 = vld [vmem:[%s3801_s20 + $0x1e8] sm:$0xff]   ;;  %v3062_v1 = vld [vmem:[%s3801_s20 + $0x170] sm:$0xff]  }
 0x107   : > { %2656 = vmatpush3.bf16.msra.mxu0 %v3024_v19  ;;  %v3056_v59 = vld [vmem:[%s3801_s20 + $0x120] sm:$0xff]   ;;  %v3060_v63 = vld [vmem:[%s3801_s20 + $0x128] sm:$0xff]   ;;  %v3063_v2 = vld [vmem:[%s3801_s20 + $0x1f0] sm:$0xff]  }
 0x108   : > { %2678 = vmatpush3.bf16.msra.mxu1 %v3025_v20  ;;  %2657 = vmatprep.subr.bf16.mxu0 %v3026_v21  ;;  %v3057_v60 = vld [vmem:[%s3801_s20 + $0x1a0] sm:$0xff]   ;;  %v3061_v0 = vld [vmem:[%s3801_s20 + $0x1a8] sm:$0xff]   ;;  %v3064_v3 = vld [vmem:[%s3801_s20 + $0x130] sm:$0xff]  }
 0x109   : > { %2679 = vmatprep.subr.bf16.mxu1 %v3027_v22  ;;  %v3065_v4 = vld [vmem:[%s3801_s20 + $0x1b0] sm:$0xff]   ;;  %v3066_v5 = vld [vmem:[%s3801_s20 + $0x178] sm:$0xff]   ;;  %v661_v9 = vld [vmem:[%s3791_s29 + $0x28] sm:$0xff] }
 0x10a   : > { %v3067_v6 = vld [vmem:[%s3801_s20 + $0x1f8] sm:$0xff]   ;;  %v669_v11 = vpack.c.bf16 %v661_v9, %v661_v9  ;;  %v662_v14 = vld [vmem:[%s3791_s29 + $0x30] sm:$0xff]  ;;  %v3070_v17 = vld [vmem:[%s3815_s15 + $0x40] sm:$0xff]  }
 0x10b   : > { %2658 = vmatpush3.bf16.msra.mxu0 %v3028_v23  ;;  %v3068_v7 = vld [vmem:[%s3801_s20 + $0x138] sm:$0xff]   ;;  %v670_v16 = vpack.c.bf16 %v662_v14, %v662_v14  ;;  %v3071_v18 = vld [vmem:[%s3815_s15 + $0xc0] sm:$0xff]   ;;  %v3074_v21 = vld [vmem:[%s3815_s15 + $0x48] sm:$0xff]  }
 0x10c   : > { %2680 = vmatpush3.bf16.msra.mxu1 %v3029_v24  ;;  %2659 = vmatprep.subr.bf16.mxu0 %v3030_v25  ;;  %v3069_v8 = vld [vmem:[%s3801_s20 + $0x1b8] sm:$0xff]   ;;  %v3072_v19 = vld [vmem:[%s3815_s15] sm:$0xff]   ;;  %v3075_v22 = vld [vmem:[%s3815_s15 + $0xc8] sm:$0xff]  }
 0x10d   : > { %2681 = vmatprep.subr.bf16.mxu1 %v3031_v26  ;;  %v663_v10 = vld [vmem:[%s3791_s29 + $0x38] sm:$0xff]  ;;  %v660_v13 = vld [vmem:[%s3791_s29 + $0x20] sm:$0xff]  ;;  %v3076_v23 = vld [vmem:[%s3815_s15 + $0x8] sm:$0xff]   ;;  %s3449_s29 = smov (!%p2589_p6), 32  }
 0x10e   : > { %v671_v12 = vpack.c.bf16 %v663_v10, %v663_v10  ;;  %v668_v15 = vpack.c.bf16 %v660_v13, %v660_v13  ;;  %v3073_v20 = vld [vmem:[%s3815_s15 + $0x80] sm:$0xff]   ;;  %v3077_v24 = vld [vmem:[%s3815_s15 + $0x88] sm:$0xff]   ;;  %v3078_v25 = vld [vmem:[%s3815_s15 + $0x50] sm:$0xff]  }
 0x10f   : > { %2660 = vmatpush3.bf16.msra.mxu0 %v3032_v27  ;;  %v3079_v26 = vld [vmem:[%s3815_s15 + $0xd0] sm:$0xff]   ;;  %v3086_v33 = vld [vmem:[%s3815_s15 + $0x60] sm:$0xff]   ;;  %v3090_v37 = vld [vmem:[%s3815_s15 + $0x68] sm:$0xff]  }
 0x110   : > { %2682 = vmatpush3.bf16.msra.mxu1 %v3033_v28  ;;  %2661 = vmatprep.subr.bf16.mxu0 %v3034_v29  ;;  %v3080_v27 = vld [vmem:[%s3815_s15 + $0x10] sm:$0xff]   ;;  %v3082_v29 = vld [vmem:[%s3815_s15 + $0x58] sm:$0xff]   ;;  %v3087_v34 = vld [vmem:[%s3815_s15 + $0xe0] sm:$0xff]  }
 0x111   : > { %2683 = vmatprep.subr.bf16.mxu1 %v3035_v30  ;;  %v3081_v28 = vld [vmem:[%s3815_s15 + $0x90] sm:$0xff]   ;;  %v3083_v30 = vld [vmem:[%s3815_s15 + $0xd8] sm:$0xff]   ;;  %v3088_v35 = vld [vmem:[%s3815_s15 + $0x20] sm:$0xff]  }
 0x112   : > { %v3089_v36 = vld [vmem:[%s3815_s15 + $0xa0] sm:$0xff]   ;;  %v3092_v39 = vld [vmem:[%s3815_s15 + $0x28] sm:$0xff]  }
 0x113   : > { %2662 = vmatpush3.bf16.msra.mxu0 %v3036_v31  ;;  %v3084_v31 = vld [vmem:[%s3815_s15 + $0x18] sm:$0xff]  }
 0x114   : > { %2684 = vmatpush3.bf16.msra.mxu1 %v3037_v32  ;;  %2691 = vmatprep.subr.bf16.mxu0 %v3038_v41  ;;  %v3085_v32 = vld [vmem:[%s3815_s15 + $0x98] sm:$0xff]   ;;  %v3094_v41 = vld [vmem:[%s3815_s15 + $0x70] sm:$0xff]  }
 0x115   : > { %2713 = vmatprep.subr.bf16.mxu1 %v3039_v42  ;;  %v3095_v42 = vld [vmem:[%s3815_s15 + $0xf0] sm:$0xff]  }
 0x116   : > { %1217 = vmatmul.mubr.bf16.vlgmr.msra.gmra.mrb[0].mxu0 %v664_v38  ;;  %v3091_v38 = vld [vmem:[%s3815_s15 + $0xe8] sm:$0xff]  }
 0x117   : > { %1257 = vmatmul.mubr.bf16.vlgmr.msra.gmra.mrb[0].mxu1 %v666_v40  ;;  %2692 = vmatpush3.bf16.msra.mxu0 %v3040_v43  ;;  %v3093_v40 = vld [vmem:[%s3815_s15 + $0xa8] sm:$0xff]   ;;  %v3096_v43 = vld [vmem:[%s3815_s15 + $0x30] sm:$0xff]  }
 0x118   : > { %2714 = vmatpush3.bf16.msra.mxu1 %v3041_v44  ;;  %2693 = vmatprep.subr.bf16.mxu0 %v3042_v45  ;;  %v3097_v44 = vld [vmem:[%s3815_s15 + $0xb0] sm:$0xff]   ;;  %v3098_v45 = vld [vmem:[%s3815_s15 + $0x78] sm:$0xff]  }
 0x119   : > { %2715 = vmatprep.subr.bf16.mxu1 %v3043_v46  ;;  %1296 = vmatprep.mubr.bf16.mxu0 %v669_v11  ;;  %v3099_v46 = vld [vmem:[%s3815_s15 + $0xf8] sm:$0xff]  }
 0x11a   : > { %1336 = vmatprep.mubr.bf16.mxu1 %v671_v12 }
 0x11b   : > { %2694 = vmatpush3.bf16.msra.mxu0 %v3044_v47  ;;  %v3100_v47 = vld [vmem:[%s3815_s15 + $0x38] sm:$0xff]  }
 0x11c   : > { %2716 = vmatpush3.bf16.msra.mxu1 %v3045_v48  ;;  %2695 = vmatprep.subr.bf16.mxu0 %v3046_v49  ;;  %v3101_v48 = vld [vmem:[%s3815_s15 + $0xb8] sm:$0xff]   ;;  %s4238_s15 = sld [smem:[#allocation30_spill]] (!%p2589_p6) }
 0x11d   : > { %2717 = vmatprep.subr.bf16.mxu1 %v3047_v50  ;;  %v1349_v49 = vld [vmem:[%s3829_s26 + $0x8] sm:$0xff] }
 0x11e   : > { %v1353_v50 = vpack.c.bf16 %v1349_v49, %v1349_v49  ;;  %v1700_v49 = vld [vmem:[%s4235_s2 + $0x10] sm:$0xff] (!%p2589_p6) }
 0x11f   : > { %2696 = vmatpush3.bf16.msra.mxu0 %v3048_v51  ;;  %v1351_v51 = vld [vmem:[%s3829_s26 + $0x18] sm:$0xff] }
 0x120   : > { %2718 = vmatpush3.bf16.msra.mxu1 %v3049_v52  ;;  %2697 = vmatprep.subr.bf16.mxu0 %v3050_v53  ;;  %v1348_v52 = vld [vmem:[%s3829_s26] sm:$0xff]  ;;  %v1350_v53 = vld [vmem:[%s3829_s26 + $0x10] sm:$0xff] }
 0x121   : > { %2719 = vmatprep.subr.bf16.mxu1 %v3051_v54  ;;  %v1355_v54 = vpack.c.bf16 %v1351_v51, %v1351_v51  ;;  %v1703_v51 = vpack.c.bf16 (!%p2589_p6), %v1700_v49, %v1700_v49 }
 0x123   : > { %2698 = vmatpush3.bf16.msra.mxu0 %v3052_v55  ;;  %v1352_v55 = vpack.c.bf16 %v1348_v52, %v1348_v52  ;;  %v3116_v52 = vld [vmem:[%s4234_s22 + $0x30] sm:$0xff] (!%p2589_p6)  }
 0x124   : > { %2720 = vmatpush3.bf16.msra.mxu1 %v3053_v56  ;;  %2699 = vmatprep.subr.bf16.mxu0 %v3054_v57  ;;  %v1354_v56 = vpack.c.bf16 %v1350_v53, %v1350_v53  ;;  %v3118_v53 = vld [vmem:[%s4234_s22 + $0x78] sm:$0xff] (!%p2589_p6)  }
 0x125   : > { %2721 = vmatprep.subr.bf16.mxu1 %v3055_v58 }
 0x127   : > { %2700 = vmatpush3.bf16.msra.mxu0 %v3056_v59 }
 0x128   : > { %2722 = vmatpush3.bf16.msra.mxu1 %v3057_v60  ;;  %2701 = vmatprep.subr.bf16.mxu0 %v3058_v61 }
 0x129   : > { %2723 = vmatprep.subr.bf16.mxu1 %v3059_v62 }
 0x12b   : > { %2702 = vmatpush3.bf16.msra.mxu0 %v3060_v63 }
 0x12c   : > { %2724 = vmatpush3.bf16.msra.mxu1 %v3061_v0  ;;  %2703 = vmatprep.subr.bf16.mxu0 %v3062_v1 }
 0x12d   : > { %2725 = vmatprep.subr.bf16.mxu1 %v3063_v2 }
 0x12f   : > { %2704 = vmatpush3.bf16.msra.mxu0 %v3064_v3 }
 0x130   : > { %2726 = vmatpush3.bf16.msra.mxu1 %v3065_v4  ;;  %2705 = vmatprep.subr.bf16.mxu0 %v3066_v5 }
 0x131   : > { %2727 = vmatprep.subr.bf16.mxu1 %v3067_v6 }
 0x133   : > { %2706 = vmatpush3.bf16.msra.mxu0 %v3068_v7 }
 0x134   : > { %2728 = vmatpush3.bf16.msra.mxu1 %v3069_v8  ;;  %2735 = vmatprep.subr.bf16.mxu0 %v3070_v17 }
 0x135   : > { %2757 = vmatprep.subr.bf16.mxu1 %v3071_v18 }
 0x136   : > { %1297 = vmatmul.mubr.bf16.vlgmr.msra.gmra.mrb[4].mxu0 %v668_v15  ;;  %v655_v15 = vld [vmem:[#allocation2] sm:$0xff] }
 0x137   : > { %1337 = vmatmul.mubr.bf16.vlgmr.msra.gmra.mrb[4].mxu1 %v670_v16  ;;  %2736 = vmatpush3.bf16.msra.mxu0 %v3072_v19 }
 0x138   : > { %2758 = vmatpush3.bf16.msra.mxu1 %v3073_v20  ;;  %2737 = vmatprep.subr.bf16.mxu0 %v3074_v21 }
 0x139   : > { %2759 = vmatprep.subr.bf16.mxu1 %v3075_v22  ;;  %1644 = vmatprep.mubr.bf16.mxu0 %v1353_v50  ;;  %v3115_v50 = vld [vmem:[%s4234_s22 + $0x70] sm:$0xff] (!%p2589_p6)  }
 0x13a   : > { %1684 = vmatprep.mubr.bf16.mxu1 %v1355_v54  ;;  %v3119_v54 = vld [vmem:[%s4234_s22 + $0x38] sm:$0xff] (!%p2589_p6)  }
 0x13b   : > { %2738 = vmatpush3.bf16.msra.mxu0 %v3076_v23 }
 0x13c   : > { %2760 = vmatpush3.bf16.msra.mxu1 %v3077_v24  ;;  %2739 = vmatprep.subr.bf16.mxu0 %v3078_v25 }
 0x13d   : > { %2761 = vmatprep.subr.bf16.mxu1 %v3079_v26 }
 0x13f   : > { %2740 = vmatpush3.bf16.msra.mxu0 %v3080_v27  ;;  %v1347_v27 = vld [vmem:[#allocation2 + $0x8] sm:$0xff] }
 0x140   : > { %2762 = vmatpush3.bf16.msra.mxu1 %v3081_v28  ;;  %2741 = vmatprep.subr.bf16.mxu0 %v3082_v29 }
 0x141   : > { %2763 = vmatprep.subr.bf16.mxu1 %v3083_v30 }
 0x143   : > { %2742 = vmatpush3.bf16.msra.mxu0 %v3084_v31  ;;  %v3102_v31 = vld [vmem:[%s4234_s22 + $0x40] sm:$0xff] (!%p2589_p6)  }
 0x144   : > { %2764 = vmatpush3.bf16.msra.mxu1 %v3085_v32  ;;  %2743 = vmatprep.subr.bf16.mxu0 %v3086_v33  ;;  %v3103_v32 = vld [vmem:[%s4234_s22] sm:$0xff] (!%p2589_p6)   ;;  %v3447_v33 = vmov (!%p2589_p6), 0.0  }
 0x145   : > { %2765 = vmatprep.subr.bf16.mxu1 %v3087_v34  ;;  %v3104_v34 = vld [vmem:[%s4234_s22 + $0x48] sm:$0xff] (!%p2589_p6)  }
 0x147   : > { %2744 = vmatpush3.bf16.msra.mxu0 %v3088_v35  ;;  %v3105_v35 = vld [vmem:[%s4234_s22 + $0x8] sm:$0xff] (!%p2589_p6)  }
 0x148   : > { %2766 = vmatpush3.bf16.msra.mxu1 %v3089_v36  ;;  %2745 = vmatprep.subr.bf16.mxu0 %v3090_v37  ;;  %v3106_v36 = vld [vmem:[%s4234_s22 + $0x50] sm:$0xff] (!%p2589_p6)  }
 0x149   : > { %2767 = vmatprep.subr.bf16.mxu1 %v3091_v38  ;;  %v3107_v37 = vld [vmem:[%s4234_s22 + $0x10] sm:$0xff] (!%p2589_p6)   ;;  %v3108_v38 = vld [vmem:[%s4234_s22 + $0x58] sm:$0xff] (!%p2589_p6)  }
 0x14b   : > { %2746 = vmatpush3.bf16.msra.mxu0 %v3092_v39  ;;  %v3109_v39 = vld [vmem:[%s4234_s22 + $0x18] sm:$0xff] (!%p2589_p6)  }
 0x14c   : > { %2768 = vmatpush3.bf16.msra.mxu1 %v3093_v40  ;;  %2747 = vmatprep.subr.bf16.mxu0 %v3094_v41  ;;  %v3110_v40 = vld [vmem:[%s4234_s22 + $0x60] sm:$0xff] (!%p2589_p6)  }
 0x14d   : > { %2769 = vmatprep.subr.bf16.mxu1 %v3095_v42  ;;  %v3114_v41 = vld [vmem:[%s4234_s22 + $0x80] sm:$0xff] (!%p2589_p6)  }
 0x14e   : > { %v3111_v42 = vld [vmem:[%s4234_s22 + $0x20] sm:$0xff] (!%p2589_p6)  }
 0x14f   : > { %2748 = vmatpush3.bf16.msra.mxu0 %v3096_v43  ;;  %v3117_v43 = vld [vmem:[%s4234_s22 + $0x88] sm:$0xff] (!%p2589_p6)  }
 0x150   : > { %2770 = vmatpush3.bf16.msra.mxu1 %v3097_v44  ;;  %2749 = vmatprep.subr.bf16.mxu0 %v3098_v45  ;;  %v3112_v44 = vld [vmem:[%s4234_s22 + $0x68] sm:$0xff] (!%p2589_p6)  }
 0x151   : > { %2771 = vmatprep.subr.bf16.mxu1 %v3099_v46  ;;  %v1699_v45 = vld [vmem:[%s4235_s2 + $0x8] sm:$0xff] (!%p2589_p6) }
 0x152   : > { %v3113_v46 = vld [vmem:[%s4234_s22 + $0x28] sm:$0xff] (!%p2589_p6)  }
 0x153   : > { %2750 = vmatpush3.bf16.msra.mxu0 %v3100_v47  ;;  %v1702_v47 = vpack.c.bf16 (!%p2589_p6), %v1699_v45, %v1699_v45 }
 0x154   : > { %2772 = vmatpush3.bf16.msra.mxu1 %v3101_v48  ;;  %2779 = vmatprep.subr.bf16.mxu0 (!%p2589_p6), %v3102_v31  ;;  %v3120_v48 = vld [vmem:[%s4234_s22 + $0x90] sm:$0xff] (!%p2589_p6)   ;;  %v3140_v31 = vld [vmem:[%s4239_s30 + $0x18] sm:$0xff] (!%p2589_p6)  }
 0x155   : > { %2832 = vmatprep.subr.bf16.mxu1 (!%p2589_p6), %v3447_v33 }
 0x156   : > { %1645 = vmatmul.mubr.bf16.vlgmr.msra.gmra.mrb[8].mxu0 %v1352_v55  ;;  %v1698_v55 = vld [vmem:[%s4235_s2] sm:$0xff] (!%p2589_p6) }
 0x157   : > { %1685 = vmatmul.mubr.bf16.vlgmr.msra.gmra.mrb[8].mxu1 %v1354_v56  ;;  %2780 = vmatpush3.bf16.msra.mxu0 (!%p2589_p6), %v3103_v32  ;;  %v3129_v56 = vld [vmem:[%s4236_s1] sm:$0xff] (!%p2589_p6)  }
 0x158   : > { %2838 = vmatprep.mubr.msk.bf16.mxu1 (!%p2589_p6), %vm3448_vm0, %v3447_v33  ;;  %2781 = vmatprep.subr.bf16.mxu0 (!%p2589_p6), %v3104_v34  ;;  %v3141_v32 = vld [vmem:[%s4239_s30 + $0x20] sm:$0xff] (!%p2589_p6)   ;;  %v3142_v34 = vld [vmem:[%s4239_s30 + $0x28] sm:$0xff] (!%p2589_p6)  }
 0x159   : > { %2833 = vmatpush3.bf16.msra.mxu1 (!%p2589_p6), %v3114_v41  ;;  %1899 = vmatprep.mubr.bf16.mxu0 (!%p2589_p6), %v1702_v47 }
 0x15a   : > { %2834 = vmatprep.subr.bf16.mxu1 (!%p2589_p6), %v3447_v33 }
 0x15b   : > { %2782 = vmatpush3.bf16.msra.mxu0 (!%p2589_p6), %v3105_v35 }
 0x15c   : > { %2783 = vmatprep.subr.bf16.mxu0 (!%p2589_p6), %v3106_v36  ;;  %v2612_v36 = vld [vmem:[#allocation13] ss:$0 sm:$0xff] (!%p2589_p6) }
 0x15d   : > { %2835 = vmatpush3.bf16.msra.mxu1 (!%p2589_p6), %v3117_v43 }
 0x15e   : > { %2836 = vmatprep.subr.bf16.mxu1 (!%p2589_p6), %v3447_v33 }
 0x15f   : > { %2784 = vmatpush3.bf16.msra.mxu0 (!%p2589_p6), %v3107_v37  ;;  %v2622_v37 = vld [vmem:[#allocation10] ss:$0 sm:$0xff] (!%p2589_p6) }
 0x160   : > { %2785 = vmatprep.subr.bf16.mxu0 (!%p2589_p6), %v3108_v38 }
 0x161   : > { %2837 = vmatpush3.bf16.msra.mxu1 (!%p2589_p6), %v3120_v48 }
 0x162   : > { %2842 = vmatprep.subr.bf16.mxu1 (!%p2589_p6), %v3447_v33 }
 0x163   : > { %2786 = vmatpush3.bf16.msra.mxu0 (!%p2589_p6), %v3109_v39 }
 0x164   : > { %2787 = vmatprep.subr.bf16.mxu0 (!%p2589_p6), %v3110_v40  ;;  %v3143_v40 = vld [vmem:[%s4239_s30 + $0x30] sm:$0xff] (!%p2589_p6)  }
 0x167   : > { %2788 = vmatpush3.bf16.msra.mxu0 (!%p2589_p6), %v3111_v42 }
 0x168   : > { %2789 = vmatprep.subr.bf16.mxu0 (!%p2589_p6), %v3112_v44 }
 0x16b   : > { %2790 = vmatpush3.bf16.msra.mxu0 (!%p2589_p6), %v3113_v46  ;;  %v3144_v46 = vld [vmem:[%s4239_s30 + $0x38] sm:$0xff] (!%p2589_p6)  }
 0x16c   : > { %2791 = vmatprep.subr.bf16.mxu0 (!%p2589_p6), %v3115_v50 }
 0x16f   : > { %2792 = vmatpush3.bf16.msra.mxu0 (!%p2589_p6), %v3116_v52  ;;  %v2631_v52 = vld [vmem:[%s4240_s5] ss:$0 sm:$0xff] (!%p2589_p6) }
 0x170   : > { %2793 = vmatprep.subr.bf16.mxu0 (!%p2589_p6), %v3118_v53 }
 0x173   : > { %2794 = vmatpush3.bf16.msra.mxu0 (!%p2589_p6), %v3119_v54 }
 0x174   : > { %2862 = vmatprep.subr.bf16.mxu0 (!%p2589_p6), %v3447_v33 }
 0x1e9   : > { %v2663_v57 = vpop.f32.mrb[0].mxu0 }
 0x1ea   : > { %v2685_v58 = vpop.f32.mrb[0].mxu1  ;;  %v2664_v59 = vpop.f32.mrb[1].mxu0 }
 0x1eb   : > { %v2686_v60 = vpop.f32.mrb[1].mxu1  ;;  %v2665_v61 = vadd.f32 %v2664_v59, %v2663_v57  ;;  %v2666_v63 = vpop.f32.mrb[2].mxu0  ;;  %v1701_v57 = vpack.c.bf16 (!%p2589_p6), %v1698_v55, %v1698_v55  ;;  %v3130_v59 = vld [vmem:[%s4236_s1 + $0x8] sm:$0xff] (!%p2589_p6)  }
 0x1ec   : > { %v2687_v62 = vadd.f32 %v2686_v60, %v2685_v58  ;;  %v2688_v0 = vpop.f32.mrb[2].mxu1  ;;  %v2667_v1 = vpop.f32.mrb[3].mxu0  ;;  %v3121_v58 = vld [vmem:[%s4237_s4] sm:$0xff] (!%p2589_p6)   ;;  %v3122_v60 = vld [vmem:[%s4237_s4 + $0x8] sm:$0xff] (!%p2589_p6)   ;;  %v3132_v63 = vld [vmem:[%s4236_s1 + $0x18] sm:$0xff] (!%p2589_p6)  }
 0x1ed   : > { %v2689_v2 = vpop.f32.mrb[3].mxu1  ;;  %2839 = vmatmul.mubr.msk.bf16.vlgmr.msra.gmra.mrb[0].mxu1 (!%p2589_p6), %vm1863_vm1, %v1703_v51  ;;  %1900 = vmatmul.mubr.bf16.vlgmr.msra.gmra.mrb[0].mxu0 (!%p2589_p6), %v1701_v57  ;;  %v3124_v0 = vld [vmem:[%s4237_s4 + $0x18] sm:$0xff] (!%p2589_p6)   ;;  %v3133_v1 = vld [vmem:[%s4236_s1 + $0x20] sm:$0xff] (!%p2589_p6)  }
 0x1ee   : > { %v1259_v3 = vadd.f32 %v2687_v62, %v2665_v61  ;;  %2858 = vmatprep.mubr.msk.bf16.mxu1 (!%p2589_p6), %vm3448_vm0, %v3447_v33  ;;  %2843 = vmatpush3.bf16.msra.mxu1 (!%p2589_p6), %v3129_v56  ;;  %v3131_v61 = vld [vmem:[%s4236_s1 + $0x10] sm:$0xff] (!%p2589_p6)   ;;  %v3125_v2 = vld [vmem:[%s4237_s4 + $0x20] sm:$0xff] (!%p2589_p6)  }
 0x1ef   : > { %2844 = vmatprep.subr.bf16.mxu1 (!%p2589_p6), %v3447_v33  ;;  %2863 = vmatpush3.bf16.msra.mxu0 (!%p2589_p6), %v3121_v58  ;;  %v3123_v62 = vld [vmem:[%s4237_s4 + $0x10] sm:$0xff] (!%p2589_p6)  }
 0x1f0   : > { %2878 = vmatprep.mubr.msk.bf16.mxu0 (!%p2589_p6), %vm3448_vm0, %v3447_v33  ;;  %2864 = vmatprep.subr.bf16.mxu0 (!%p2589_p6), %v3447_v33  ;;  %v2613_v58 = vld [vmem:[#allocation6] ss:$0 sm:$0xff] (!%p2589_p6) }
 0x1f2   : > { %2845 = vmatpush3.bf16.msra.mxu1 (!%p2589_p6), %v3130_v59 }
 0x1f3   : > { %2846 = vmatprep.subr.bf16.mxu1 (!%p2589_p6), %v3447_v33  ;;  %2865 = vmatpush3.bf16.msra.mxu0 (!%p2589_p6), %v3122_v60 }
 0x1f4   : > { %2866 = vmatprep.subr.bf16.mxu0 (!%p2589_p6), %v3447_v33 }
 0x1f6   : > { %2847 = vmatpush3.bf16.msra.mxu1 (!%p2589_p6), %v3131_v61 }
 0x1f7   : > { %2848 = vmatprep.subr.bf16.mxu1 (!%p2589_p6), %v3447_v33  ;;  %2867 = vmatpush3.bf16.msra.mxu0 (!%p2589_p6), %v3123_v62 }
 0x1f8   : > { %2868 = vmatprep.subr.bf16.mxu0 (!%p2589_p6), %v3447_v33 }
 0x1fa   : > { %2849 = vmatpush3.bf16.msra.mxu1 (!%p2589_p6), %v3132_v63 }
 0x1fb   : > { %2850 = vmatprep.subr.bf16.mxu1 (!%p2589_p6), %v3447_v33  ;;  %2869 = vmatpush3.bf16.msra.mxu0 (!%p2589_p6), %v3124_v0 }
 0x1fc   : > { %2870 = vmatprep.subr.bf16.mxu0 (!%p2589_p6), %v3447_v33 }
 0x1fe   : > { %2851 = vmatpush3.bf16.msra.mxu1 (!%p2589_p6), %v3133_v1 }
 0x1ff   : > { %2852 = vmatprep.subr.bf16.mxu1 (!%p2589_p6), %v3447_v33  ;;  %2871 = vmatpush3.bf16.msra.mxu0 (!%p2589_p6), %v3125_v2 }
 0x200   : > { %2872 = vmatprep.subr.bf16.mxu0 (!%p2589_p6), %v3447_v33 }
 0x209   : > { %v2707_v4 = vpop.f32.mrb[4].mxu0 }
 0x20a   : > { %v2729_v5 = vpop.f32.mrb[4].mxu1  ;;  %v2708_v6 = vpop.f32.mrb[5].mxu0 }
 0x20b   : > { %v2709_v7 = vadd.f32 %v2708_v6, %v2707_v4  ;;  %v2730_v8 = vpop.f32.mrb[5].mxu1  ;;  %v2710_v9 = vpop.f32.mrb[6].mxu0 }
 0x20c   : > { %v2731_v10 = vadd.f32 %v2730_v8, %v2729_v5  ;;  %v2732_v11 = vpop.f32.mrb[6].mxu1  ;;  %v2711_v12 = vpop.f32.mrb[7].mxu0  ;;  %v2611_v5 = vld [vmem:[#allocation9] ss:$0 sm:$0xff] (!%p2589_p6)  ;;  %v3128_v9 = vld [vmem:[%s4237_s4 + $0x38] sm:$0xff] (!%p2589_p6)  }
 0x20d   : > { %v1299_v13 = vadd.f32 %v2709_v7, %v1259_v3  ;;  %v2733_v14 = vpop.f32.mrb[7].mxu1  ;;  %v3126_v3 = vld [vmem:[%s4237_s4 + $0x28] sm:$0xff] (!%p2589_p6)   ;;  %v3127_v7 = vld [vmem:[%s4237_s4 + $0x30] sm:$0xff] (!%p2589_p6)  }
 0x20e   : > { %2873 = vmatpush3.bf16.msra.mxu0 (!%p2589_p6), %v3126_v3  ;;  %v3134_v11 = vld [vmem:[%s4236_s1 + $0x28] sm:$0xff] (!%p2589_p6)   ;;  %v3135_v12 = vld [vmem:[%s4236_s1 + $0x30] sm:$0xff] (!%p2589_p6)  }
 0x20f   : > { %v1339_v16 = vadd.f32 %v2731_v10, %v1299_v13  ;;  %2874 = vmatprep.subr.bf16.mxu0 (!%p2589_p6), %v3447_v33  ;;  %2853 = vmatpush3.bf16.msra.mxu1 (!%p2589_p6), %v3134_v11  ;;  %v3136_v13 = vld [vmem:[%s4236_s1 + $0x38] sm:$0xff] (!%p2589_p6)  }
 0x210   : > { %2854 = vmatprep.subr.bf16.mxu1 (!%p2589_p6), %v3447_v33 }
 0x211   : > { %v1344_v17 = vadd.f32 %v1339_v16, %v655_v15 }
 0x212   : > { %2875 = vmatpush3.bf16.msra.mxu0 (!%p2589_p6), %v3127_v7 }
 0x213   : > { %1345 = vst [vmem:[#allocation2] sm:$0xff] %v1344_v17  ;;  %2876 = vmatprep.subr.bf16.mxu0 (!%p2589_p6), %v3447_v33  ;;  %2855 = vmatpush3.bf16.msra.mxu1 (!%p2589_p6), %v3135_v12 }
 0x214   : > { %2856 = vmatprep.subr.bf16.mxu1 (!%p2589_p6), %v3447_v33 }
 0x216   : > { %2877 = vmatpush3.bf16.msra.mxu0 (!%p2589_p6), %v3128_v9 }
 0x217   : > { %2857 = vmatpush3.bf16.msra.mxu1 (!%p2589_p6), %v3136_v13 }
 0x218   : > { %2882 = vmatprep.subr.bf16.mxu1 (!%p2589_p6), %v3447_v33 }
 0x21a   : > { %v1947_v4 = vld [vmem:[#allocation2] sm:$0xff] (!%p2589_p6) }
 0x21b   : > { %v1955_v6 = vadd.f32 (!%p2589_p6), %v2611_v5, %v1947_v4 }
 0x21d   : > { %v1967_v8 = vmax.f32 (!%p2589_p6), %v1955_v6, 0.0 }
 0x21f   : > { %v1968_v10 = vpack.c.bf16 (!%p2589_p6), %v1967_v8, %v1967_v8 }
 0x221   : > { %2879 = vmatmul.mubr.bf16.vlgmr.msra.gmra.mrb[4].mxu0 (!%p2589_p6), %v1968_v10 }
 0x229   : > { %v2751_v18 = vpop.f32.mrb[8].mxu0 }
 0x22a   : > { %v2773_v19 = vpop.f32.mrb[8].mxu1  ;;  %v2752_v20 = vpop.f32.mrb[9].mxu0 }
 0x22b   : > { %v2753_v21 = vadd.f32 %v2752_v20, %v2751_v18  ;;  %v2774_v22 = vpop.f32.mrb[9].mxu1  ;;  %v2754_v23 = vpop.f32.mrb[10].mxu0  ;;  %v2590_v20 = vld [vmem:[%s4238_s15] ss:$0 sm:$0xff] (!%p2589_p6) }
 0x22c   : > { %v2775_v24 = vadd.f32 %v2774_v22, %v2773_v19  ;;  %v2776_v25 = vpop.f32.mrb[10].mxu1  ;;  %v2755_v26 = vpop.f32.mrb[11].mxu0  ;;  %1697 = sbr.rel (%p2589_p6) target bundleno = 1080 (0x438), region = 116 }
 0x22d   : > { %v2777_v28 = vpop.f32.mrb[11].mxu1 }
 0x22e   : > { %v1687_v29 = vadd.f32 %v2775_v24, %v2753_v21 }
 0x230   : > { %v1692_v30 = vadd.f32 %v1687_v29, %v1347_v27  ;;  %v3137_v27 = vld [vmem:[%s4239_s30] sm:$0xff] (!%p2589_p6)   ;;  %v3138_v29 = vld [vmem:[%s4239_s30 + $0x8] sm:$0xff] (!%p2589_p6)  }
 0x232   : > { %1693 = vst [vmem:[#allocation2 + $0x8] sm:$0xff] %v1692_v30  ;;  %v3139_v30 = vld [vmem:[%s4239_s30 + $0x10] sm:$0xff] (!%p2589_p6)  }
 0x239   : > { %v1956_v35 = vld [vmem:[#allocation2 + $0x8] sm:$0xff] }
 0x23a   : > { %v1964_v38 = vadd.f32 %v2612_v36, %v1956_v35 }
 0x23c   : > { %v1969_v45 = vmax.f32 %v1964_v38, 0.0 }
 0x23e   : > { %v1970_v47 = vpack.c.bf16 %v1969_v45, %v1969_v45 }
 0x2c0   : > { %v1941_v14 = vpop.f32.mrb[0].mxu1  ;;  %v2795_v18 = vpop.f32.mrb[0].mxu0 }
 0x2c1   : > { %v2840_v15 = vpop.f32.mrb[1].mxu1  ;;  %v2796_v19 = vpop.f32.mrb[1].mxu0 }
 0x2c2   : > { %v1944_v16 = vpop.f32.mrb[2].mxu1  ;;  %v2797_v21 = vadd.f32 %v2796_v19, %v2795_v18  ;;  %v2798_v22 = vpop.f32.mrb[2].mxu0 }
 0x2c3   : > { %v2841_v17 = vpop.f32.mrb[3].mxu1  ;;  %v2799_v23 = vpop.f32.mrb[3].mxu0 }
 0x2c4   : > { %v1902_v24 = vadd.f32 %v2797_v21, %v2590_v20 }
 0x2c6   : > { %v1942_v25 = vadd.f32 %v1941_v14, %v1902_v24 }
 0x2c8   : > { %v1965_v26 = vmax.f32 %v1942_v25, 0.0 }
 0x2ca   : > { %v1966_v28 = vpack.c.bf16 %v1965_v26, %v1965_v26 }
 0x2cc   : > { %2859 = vmatmul.mubr.bf16.vlgmr.msra.gmra.mrb[4].mxu1 %v1966_v28 }
 0x2cd   : > { %2883 = vmatpush3.bf16.msra.mxu1 %v3137_v27  ;;  %2898 = vmatprep.mubr.msk.bf16.mxu1 %vm3448_vm0, %v3447_v33 }
 0x2ce   : > { %2884 = vmatprep.subr.bf16.mxu1 %v3447_v33 }
 0x2d1   : > { %2885 = vmatpush3.bf16.msra.mxu1 %v3138_v29 }
 0x2d2   : > { %2886 = vmatprep.subr.bf16.mxu1 %v3447_v33 }
 0x2d5   : > { %2887 = vmatpush3.bf16.msra.mxu1 %v3139_v30 }
 0x2d6   : > { %2888 = vmatprep.subr.bf16.mxu1 %v3447_v33 }
 0x2d9   : > { %2889 = vmatpush3.bf16.msra.mxu1 %v3140_v31 }
 0x2da   : > { %2890 = vmatprep.subr.bf16.mxu1 %v3447_v33 }
 0x2dd   : > { %2891 = vmatpush3.bf16.msra.mxu1 %v3141_v32 }
 0x2de   : > { %2892 = vmatprep.subr.bf16.mxu1 %v3447_v33 }
 0x2e1   : > { %2893 = vmatpush3.bf16.msra.mxu1 %v3142_v34 }
 0x2e2   : > { %2894 = vmatprep.subr.bf16.mxu1 %v3447_v33 }
 0x2e5   : > { %2895 = vmatpush3.bf16.msra.mxu1 %v3143_v40 }
 0x2e6   : > { %2896 = vmatprep.subr.bf16.mxu1 %v3447_v33 }
 0x2e9   : > { %2897 = vmatpush3.bf16.msra.mxu1 %v3144_v46 }
 0x2ec   : > { %2899 = vmatmul.mubr.bf16.vlgmr.msra.gmra.mrb[8].mxu1 %v1970_v47 }
 0x2f4   : > { %v2187_v39 = vpop.f32.mrb[4].mxu0 }
 0x2f5   : > { %v2188_v41 = vadd.f32 %v2622_v37, %v2187_v39  ;;  %v2880_v42 = vpop.f32.mrb[5].mxu0 }
 0x2f6   : > { %v2190_v43 = vpop.f32.mrb[6].mxu0 }
 0x2f7   : > { %2305 = vrot.lane.b32.xlu0 %v2188_v41, %s3449_s29  ;;  %v2881_v44 = vpop.f32.mrb[7].mxu0 }
 0x369   : > { %v2306_v59 = vpop.permute.xlu0 %2305 }
 0x39f   : > { %v2076_v48 = vpop.f32.mrb[4].mxu1 }
 0x3a0   : > { %v2860_v49 = vpop.f32.mrb[5].mxu1  ;;  %v2077_v33 = vadd.f32 %v2613_v58, %v2076_v48 }
 0x3a1   : > { %v2079_v50 = vpop.f32.mrb[6].mxu1 }
 0x3a2   : > { %v2861_v51 = vpop.f32.mrb[7].mxu1  ;;  %v2313_v60 = vsel %vm2312_vm2, %v2077_v33, %v2306_v59 }
 0x3bf   : > { %v2298_v53 = vpop.f32.mrb[8].mxu1 }
 0x3c0   : > { %v2299_v54 = vadd.f32 %v2631_v52, %v2298_v53  ;;  %v2900_v55 = vpop.f32.mrb[9].mxu1 }
 0x3c1   : > { %v2301_v56 = vpop.f32.mrb[10].mxu1 }
 0x3c2   : > { %2309 = vrot.lane.b32.xlu0 %v2299_v54, %s3450_s3  ;;  %v2901_v57 = vpop.f32.mrb[11].mxu1 }
 0x434   : > { %v2310_v61 = vpop.permute.xlu0 %2309 }
 0x435   : > { %v2315_v62 = vsel %vm2314_vm3, %v2313_v60, %v2310_v61 }
 0x436   : > { %v2317_v63 = vsel %vm2316_vm4, %v2315_v62, 0.0 }
 0x437   : > { %2318 = vst [vmem:[#allocation14] sm:$0xff] %v2317_v63 }
 0x438 PF: > { %p2960_p3 = scmp.eq.s32.totalorder %s3553_s24, 1  ;;  %s3451_s9 = smov [#allocation14]  }
 0x439   : > { %s2326_s14 = sshll.u32 %s3451_s9, 4  ;;  %s2327_s14 = int_to_ptr.vmem [resolvable:$true] %s2326_s14 }
 0x43a   : > { %s3347_s26 = scalar_lea.vmem %s2327_s14, 128  ;;  %p3354_p5 = scmp.lt.s32.totalorder %s2327_s14, %s2327_s14 }
 0x43b   : > { %p3348_p10 = scmp.ne.s32.totalorder %s2327_s14, %s3347_s26  ;;  %p3355_p1 = scmp.lt.s32.totalorder %s3347_s26, %s3347_s26 }
 0x43d   : > { %p3349_p12 = pnand %p3348_p10, %p2960_p3  ;;  %p3356_p4 = por %p3355_p1, %p3354_p5 }
 0x43f   : > { %p3350_p0 = pneg %p3349_p12 }
 0x441   : > { %p3357_p11 = pnand %p3356_p4, %p3350_p0 }
 0x443   : > { %3360 = shalt.err (!%p3357_p11)
}
 0x444   : > { %s4241_s18 = sld [smem:[#allocation36_spill]] }
 0x44a   : > { %s4242_s16 = smov %s4241_s18  ;;  %s3361_s17 = scalar_lea.hbm %s4241_s18, 128 }
 0x44b   : > { %p3362_p13 = scmp.ne.s32.totalorder %s4242_s16, %s3361_s17  ;;  %p3367_p8 = scmp.lt.u32.totalorder %s3361_s17, %s4242_s16 }
 0x44d   : > { %p3363_p7 = pnand %p3362_p13, %p2960_p3 }
 0x44f   : > { %p3364_p9 = pneg %p3363_p7 }
 0x451   : > { %p3369_p2 = pnand %p3367_p8, %p3364_p9 }
 0x453   : > { %3372 = shalt.err (!%p3369_p2)
}
 0x454   : > { %2925 = dma.vmem_to_hbm [thread:$0]  (%p2960_p3), %s2327_s14, 128, %s4242_s16, [#allocation5]  }
 0x455   : > { %3418 = dma.done.wait (%p2960_p3), [#allocation5], 128  }
 0x456   : > { %3420 = vsyncadd (%p2960_p3), [#allocation5], 4294967168 }
 0x457 PF: > { %s4243_s21 = sld [smem:[#allocation24_spill]]  ;;  %s4244_s20 = sld [smem:[#allocation23_spill]] }
 0x458   : > { %s4245_s25 = sld [smem:[#allocation25_spill]]  ;;  %s4246_s18 = smov %s3427_s19 }
 0x45d   : > { %p28_p6 = scmp.ge.s32.totalorder %s4243_s21, 4   ;;  %s4247_s19 = smov %s4244_s20 }
 0x45e   : > { %s4248_s20 = smov %s4245_s25 }
 0x45f   :  { %30 = sbr.rel (!%p28_p6) target bundleno = 18 (0x12), region = 167 }
 0x466   :  { %2339 = vsyncpa [#allocation4], 1 }
 0x467   :  { %2341 = vsyncpa [#allocation4 + $0x1], 1 }
 0x468   :  { %2342 = vsyncpa [#allocation7], 1 }
 0x469   :  { %2343 = vsyncpa [#allocation11], 1 }
 0x46a   :  { %2344 = vsyncpa [#allocation5], 1 }
 0x46b   :  { %2346 = vsyncpa [#allocation5 + $0x1], 1 }

</bundles_post_ra>
